<compile_context>
chip_gen: v7x
topology: tpu7x:2x2x1
jax: 0.10.0
libtpu: 0.0.40
codegen_flags: <defaults>
</compile_context>

<pallas_src>
import jax
import jax.numpy as jnp
from jax.experimental import pallas as pl
from jax.experimental.pallas import tpu as pltpu

K = 3           # depthwise conv kernel size (ConvMixer-style, "same" padding)
PAD = K // 2


def _residual_kernel(x_ref, w_ref, b_ref, o_ref, xpad_scr):
    """Fused depthwise-conv(KxK,'same') + GELU + residual add for one batch tile.

    x_ref:    (B, H, W, C)                input tile (also the residual source)
    w_ref:    (K, K, C)                   depthwise conv weights
    b_ref:    (1, 1, C)                   conv bias
    o_ref:    (B, H, W, C)                output tile
    xpad_scr: (B, H+2*PAD, W+2*PAD, C) f32  VMEM halo-padded scratch copy
    """
    B, H, W, C = x_ref.shape

    x = x_ref[...]
    xf = x.astype(jnp.float32)

    # Build the zero-padded copy entirely in VMEM (no HBM pad materialization,
    # no second padded input stream).
    xpad_scr[...] = jnp.zeros_like(xpad_scr)
    xpad_scr[:, PAD:PAD + H, PAD:PAD + W, :] = xf
    xpad = xpad_scr[...]

    # Hoist the W-axis (sublane) shifts: 3 shifted slabs, reused across the
    # 3 H-axis taps (H-axis offsets are cheap row selects).
    w_shifted = [xpad[:, :, k2:k2 + W, :] for k2 in range(K)]

    acc = jnp.zeros((B, H, W, C), jnp.float32)
    for k1 in range(K):
        for k2 in range(K):
            tap = w_shifted[k2][:, k1:k1 + H, :, :]
            acc = acc + tap * w_ref[k1, k2, :].astype(jnp.float32)

    acc = acc + b_ref[0, 0, :].astype(jnp.float32)

    # Exact (erf-based) GELU, matching torch.nn.GELU() default.
    inv_sqrt2 = jnp.float32(0.7071067811865476)
    y = 0.5 * acc * (1.0 + jax.lax.erf(acc * inv_sqrt2))

    # Residual: fn(x) + x  (residual read from the same single input stream).
    o_ref[...] = (y + xf).astype(o_ref.dtype)


def _pick_batch_tile(n, per_image_bytes, budget_bytes=2 * 1024 * 1024):
    """Largest divisor of n whose per-step x block stays within the VMEM budget,
    while keeping >= 2 grid steps when n >= 2 (so both v7x TCs get work)."""
    cap = max(1, budget_bytes // max(per_image_bytes, 1))
    bt = 1
    for d in range(1, n + 1):
        if n % d == 0 and d <= cap:
            bt = d
    if n >= 2:
        while bt > 1 and n // bt < 2:
            bt -= 1
            while n % bt != 0:
                bt -= 1
    return bt


def residual_convmixer_nhwc(x, w, b, *, batch_tile=None):
    """Residual(fn)(x) with fn = depthwise conv(K,K) + GELU; x in NHWC."""
    N, H, W, C = x.shape
    if batch_tile is None:
        batch_tile = _pick_batch_tile(N, H * W * C * x.dtype.itemsize)
    assert N % batch_tile == 0

    b3 = b.reshape(1, 1, C)
    grid = (N // batch_tile,)

    return pl.pallas_call(
        _residual_kernel,
        out_shape=jax.ShapeDtypeStruct((N, H, W, C), x.dtype),
        grid=grid,
        in_specs=[
            pl.BlockSpec((batch_tile, H, W, C), lambda n: (n, 0, 0, 0)),
            pl.BlockSpec((K, K, C), lambda n: (0, 0, 0)),
            pl.BlockSpec((1, 1, C), lambda n: (0, 0, 0)),
        ],
        out_specs=pl.BlockSpec((batch_tile, H, W, C), lambda n: (n, 0, 0, 0)),
        scratch_shapes=[
            pltpu.VMEM((batch_tile, H + 2 * PAD, W + 2 * PAD, C), jnp.float32),
        ],
        compiler_params=pltpu.CompilerParams(
            dimension_semantics=("parallel",),
            vmem_limit_bytes=32 * 1024 * 1024,
        ),
    )(x, w, b3)


def residual_convmixer(x_nchw, w, b, *, batch_tile=None):
    """NCHW wrapper (PyTorch layout parity). Prefer the NHWC entry point in a
    real model so these two extra HBM transpose passes are avoided."""
    x = jnp.transpose(x_nchw, (0, 2, 3, 1))           # NCHW -> NHWC
    out = residual_convmixer_nhwc(x, w, b, batch_tile=batch_tile)
    return jnp.transpose(out, (0, 3, 1, 2))           # NHWC -> NCHW


def residual_reference(x_nchw, w, b):
    """Plain-JAX reference for the same Residual(fn)."""
    x = jnp.transpose(x_nchw, (0, 2, 3, 1)).astype(jnp.float32)   # NHWC
    rhs = w.astype(jnp.float32)[:, :, None, :]        # (K, K, 1, C) HWIO depthwise
    y = jax.lax.conv_general_dilated(
        x, rhs, window_strides=(1, 1), padding="SAME",
        dimension_numbers=("NHWC", "HWIO", "NHWC"),
        feature_group_count=x.shape[-1])
    y = y + b.astype(jnp.float32)
    y = jax.nn.gelu(y, approximate=False)
    return jnp.transpose(y + x, (0, 3, 1, 2))


if __name__ == "__main__":
    key = jax.random.PRNGKey(0)
    kx, kw, kb = jax.random.split(key, 3)

    N, C, H, W = 2, 4, 16, 16
    x = jax.random.normal(kx, (N, C, H, W), dtype=jnp.float32)
    # Deterministic synthetic parameters of the wrapped depthwise conv.
    w = jax.random.normal(kw, (K, K, C), dtype=jnp.float32) * 0.1
    b = jax.random.normal(kb, (C,), dtype=jnp.float32) * 0.1

    ref = residual_reference(x, w, b)

    # f32 path: bit-level parity with the erf GELU reference.
    out = jax.block_until_ready(residual_convmixer(x, w, b))
    assert out.shape == (N, C, H, W)
    assert jnp.allclose(out, ref, atol=1e-5, rtol=1e-5), "f32 mismatch vs reference"

    # bf16 I/O path (halves HBM bytes on this mem-bound kernel; f32 accumulation
    # in-kernel) -- relaxed tolerance for the storage quantization.
    out_bf16 = jax.block_until_ready(
        residual_convmixer(x.astype(jnp.bfloat16),
                           w.astype(jnp.bfloat16),
                           b.astype(jnp.bfloat16)))
    assert out_bf16.shape == (N, C, H, W)
    assert jnp.allclose(out_bf16.astype(jnp.float32), ref, atol=1e-1, rtol=1e-1), \
        "bf16 mismatch vs reference"

    print("KERNEL_OK")
</pallas_src>

<mosaic_0001>
module attributes {stable_mosaic.version = 11 : i64} {
  func.func @_residual_kernel(%arg0: i32, %arg1: memref<1x16x16x4xf32, #tpu.memory_space<vmem>>, %arg2: memref<3x3x4xf32, #tpu.memory_space<vmem>>, %arg3: memref<1x1x4xf32, #tpu.memory_space<vmem>>, %arg4: memref<1x16x16x4xf32, #tpu.memory_space<vmem>>, %arg5: memref<1x18x18x4xf32, #tpu.memory_space<vmem>>) attributes {dimension_semantics = [#tpu.dimension_semantics<parallel>], iteration_bounds = array<i64: 2>, scalar_prefetch = 0 : i64, scratch_operands = 1 : i64, tpu.core_type = #tpu.core_type<tc>, window_params = [{transform_indices = @transform_0, window_bounds = array<i64: 1, 16, 16, 4>}, {pipeline_mode = #tpu.pipeline_mode<synchronous>, transform_indices = @transform_1, window_bounds = array<i64: 3, 3, 4>}, {pipeline_mode = #tpu.pipeline_mode<synchronous>, transform_indices = @transform_2, window_bounds = array<i64: 1, 1, 4>}, {transform_indices = @transform_3, window_bounds = array<i64: 1, 16, 16, 4>}]} {
    %c0 = arith.constant 0 : index
    %c0_0 = arith.constant 0 : index
    %c0_1 = arith.constant 0 : index
    %c0_2 = arith.constant 0 : index
    %0 = vector.load %arg1[%c0, %c0_0, %c0_1, %c0_2] : memref<1x16x16x4xf32, #tpu.memory_space<vmem>>, vector<1x16x16x4xf32>
    %cst = arith.constant 0.000000e+00 : f32
    %1 = vector.broadcast %cst : f32 to vector<1x18x18x4xf32>
    %c0_3 = arith.constant 0 : index
    %c0_4 = arith.constant 0 : index
    %c0_5 = arith.constant 0 : index
    %c0_6 = arith.constant 0 : index
    %2 = vector.load %arg5[%c0_3, %c0_4, %c0_5, %c0_6] : memref<1x18x18x4xf32, #tpu.memory_space<vmem>>, vector<1x18x18x4xf32>
    tpu.vector_store %arg5[%c0_3, %c0_4, %c0_5, %c0_6], %1 {strides = array<i32>} : memref<1x18x18x4xf32, #tpu.memory_space<vmem>>, vector<1x18x18x4xf32>,
    %c0_7 = arith.constant 0 : index
    %c1 = arith.constant 1 : index
    %c1_8 = arith.constant 1 : index
    %c0_9 = arith.constant 0 : index
    %3 = vector.load %arg5[%c0_7, %c1, %c1_8, %c0_9] : memref<1x18x18x4xf32, #tpu.memory_space<vmem>>, vector<1x16x16x4xf32>
    tpu.vector_store %arg5[%c0_7, %c1, %c1_8, %c0_9], %0 {strides = array<i32>} : memref<1x18x18x4xf32, #tpu.memory_space<vmem>>, vector<1x16x16x4xf32>,
    %c0_10 = arith.constant 0 : index
    %c0_11 = arith.constant 0 : index
    %c0_12 = arith.constant 0 : index
    %c0_13 = arith.constant 0 : index
    %4 = vector.load %arg5[%c0_10, %c0_11, %c0_12, %c0_13] : memref<1x18x18x4xf32, #tpu.memory_space<vmem>>, vector<1x18x18x4xf32>
    %5 = vector.extract_strided_slice %4 {offsets = [0, 0, 0, 0], sizes = [1, 18, 16, 4], strides = [1, 1, 1, 1]} : vector<1x18x18x4xf32> to vector<1x18x16x4xf32>
    %6 = vector.extract_strided_slice %4 {offsets = [0, 0, 1, 0], sizes = [1, 18, 16, 4], strides = [1, 1, 1, 1]} : vector<1x18x18x4xf32> to vector<1x18x16x4xf32>
    %7 = vector.extract_strided_slice %4 {offsets = [0, 0, 2, 0], sizes = [1, 18, 16, 4], strides = [1, 1, 1, 1]} : vector<1x18x18x4xf32> to vector<1x18x16x4xf32>
    %cst_14 = arith.constant 0.000000e+00 : f32
    %8 = vector.broadcast %cst_14 : f32 to vector<1x16x16x4xf32>
    %9 = vector.extract_strided_slice %5 {offsets = [0, 0, 0, 0], sizes = [1, 16, 16, 4], strides = [1, 1, 1, 1]} : vector<1x18x16x4xf32> to vector<1x16x16x4xf32>
    %c0_15 = arith.constant 0 : index
    %c0_16 = arith.constant 0 : index
    %c0_17 = arith.constant 0 : index
    %10 = vector.load %arg2[%c0_15, %c0_16, %c0_17] : memref<3x3x4xf32, #tpu.memory_space<vmem>>, vector<1x1x4xf32>
    %11 = vector.shape_cast %10 : vector<1x1x4xf32> to vector<4xf32>
    %12 = vector.shape_cast %11 : vector<4xf32> to vector<1x1x1x4xf32>
    %13 = vector.broadcast %12 : vector<1x1x1x4xf32> to vector<1x16x16x4xf32>
    %14 = arith.mulf %9, %13 : vector<1x16x16x4xf32>
    %15 = arith.addf %8, %14 : vector<1x16x16x4xf32>
    %16 = vector.extract_strided_slice %6 {offsets = [0, 0, 0, 0], sizes = [1, 16, 16, 4], strides = [1, 1, 1, 1]} : vector<1x18x16x4xf32> to vector<1x16x16x4xf32>
    %c0_18 = arith.constant 0 : index
    %c1_19 = arith.constant 1 : index
    %c0_20 = arith.constant 0 : index
    %17 = vector.load %arg2[%c0_18, %c1_19, %c0_20] : memref<3x3x4xf32, #tpu.memory_space<vmem>>, vector<1x1x4xf32>
    %18 = vector.shape_cast %17 : vector<1x1x4xf32> to vector<4xf32>
    %19 = vector.shape_cast %18 : vector<4xf32> to vector<1x1x1x4xf32>
    %20 = vector.broadcast %19 : vector<1x1x1x4xf32> to vector<1x16x16x4xf32>
    %21 = arith.mulf %16, %20 : vector<1x16x16x4xf32>
    %22 = arith.addf %15, %21 : vector<1x16x16x4xf32>
    %23 = vector.extract_strided_slice %7 {offsets = [0, 0, 0, 0], sizes = [1, 16, 16, 4], strides = [1, 1, 1, 1]} : vector<1x18x16x4xf32> to vector<1x16x16x4xf32>
    %c0_21 = arith.constant 0 : index
    %c2 = arith.constant 2 : index
    %c0_22 = arith.constant 0 : index
    %24 = vector.load %arg2[%c0_21, %c2, %c0_22] : memref<3x3x4xf32, #tpu.memory_space<vmem>>, vector<1x1x4xf32>
    %25 = vector.shape_cast %24 : vector<1x1x4xf32> to vector<4xf32>
    %26 = vector.shape_cast %25 : vector<4xf32> to vector<1x1x1x4xf32>
    %27 = vector.broadcast %26 : vector<1x1x1x4xf32> to vector<1x16x16x4xf32>
    %28 = arith.mulf %23, %27 : vector<1x16x16x4xf32>
    %29 = arith.addf %22, %28 : vector<1x16x16x4xf32>
    %30 = vector.extract_strided_slice %5 {offsets = [0, 1, 0, 0], sizes = [1, 16, 16, 4], strides = [1, 1, 1, 1]} : vector<1x18x16x4xf32> to vector<1x16x16x4xf32>
    %c1_23 = arith.constant 1 : index
    %c0_24 = arith.constant 0 : index
    %c0_25 = arith.constant 0 : index
    %31 = vector.load %arg2[%c1_23, %c0_24, %c0_25] : memref<3x3x4xf32, #tpu.memory_space<vmem>>, vector<1x1x4xf32>
    %32 = vector.shape_cast %31 : vector<1x1x4xf32> to vector<4xf32>
    %33 = vector.shape_cast %32 : vector<4xf32> to vector<1x1x1x4xf32>
    %34 = vector.broadcast %33 : vector<1x1x1x4xf32> to vector<1x16x16x4xf32>
    %35 = arith.mulf %30, %34 : vector<1x16x16x4xf32>
    %36 = arith.addf %29, %35 : vector<1x16x16x4xf32>
    %37 = vector.extract_strided_slice %6 {offsets = [0, 1, 0, 0], sizes = [1, 16, 16, 4], strides = [1, 1, 1, 1]} : vector<1x18x16x4xf32> to vector<1x16x16x4xf32>
    %c1_26 = arith.constant 1 : index
    %c1_27 = arith.constant 1 : index
    %c0_28 = arith.constant 0 : index
    %38 = vector.load %arg2[%c1_26, %c1_27, %c0_28] : memref<3x3x4xf32, #tpu.memory_space<vmem>>, vector<1x1x4xf32>
    %39 = vector.shape_cast %38 : vector<1x1x4xf32> to vector<4xf32>
    %40 = vector.shape_cast %39 : vector<4xf32> to vector<1x1x1x4xf32>
    %41 = vector.broadcast %40 : vector<1x1x1x4xf32> to vector<1x16x16x4xf32>
    %42 = arith.mulf %37, %41 : vector<1x16x16x4xf32>
    %43 = arith.addf %36, %42 : vector<1x16x16x4xf32>
    %44 = vector.extract_strided_slice %7 {offsets = [0, 1, 0, 0], sizes = [1, 16, 16, 4], strides = [1, 1, 1, 1]} : vector<1x18x16x4xf32> to vector<1x16x16x4xf32>
    %c1_29 = arith.constant 1 : index
    %c2_30 = arith.constant 2 : index
    %c0_31 = arith.constant 0 : index
    %45 = vector.load %arg2[%c1_29, %c2_30, %c0_31] : memref<3x3x4xf32, #tpu.memory_space<vmem>>, vector<1x1x4xf32>
    %46 = vector.shape_cast %45 : vector<1x1x4xf32> to vector<4xf32>
    %47 = vector.shape_cast %46 : vector<4xf32> to vector<1x1x1x4xf32>
    %48 = vector.broadcast %47 : vector<1x1x1x4xf32> to vector<1x16x16x4xf32>
    %49 = arith.mulf %44, %48 : vector<1x16x16x4xf32>
    %50 = arith.addf %43, %49 : vector<1x16x16x4xf32>
    %51 = vector.extract_strided_slice %5 {offsets = [0, 2, 0, 0], sizes = [1, 16, 16, 4], strides = [1, 1, 1, 1]} : vector<1x18x16x4xf32> to vector<1x16x16x4xf32>
    %c2_32 = arith.constant 2 : index
    %c0_33 = arith.constant 0 : index
    %c0_34 = arith.constant 0 : index
    %52 = vector.load %arg2[%c2_32, %c0_33, %c0_34] : memref<3x3x4xf32, #tpu.memory_space<vmem>>, vector<1x1x4xf32>
    %53 = vector.shape_cast %52 : vector<1x1x4xf32> to vector<4xf32>
    %54 = vector.shape_cast %53 : vector<4xf32> to vector<1x1x1x4xf32>
    %55 = vector.broadcast %54 : vector<1x1x1x4xf32> to vector<1x16x16x4xf32>
    %56 = arith.mulf %51, %55 : vector<1x16x16x4xf32>
    %57 = arith.addf %50, %56 : vector<1x16x16x4xf32>
    %58 = vector.extract_strided_slice %6 {offsets = [0, 2, 0, 0], sizes = [1, 16, 16, 4], strides = [1, 1, 1, 1]} : vector<1x18x16x4xf32> to vector<1x16x16x4xf32>
    %c2_35 = arith.constant 2 : index
    %c1_36 = arith.constant 1 : index
    %c0_37 = arith.constant 0 : index
    %59 = vector.load %arg2[%c2_35, %c1_36, %c0_37] : memref<3x3x4xf32, #tpu.memory_space<vmem>>, vector<1x1x4xf32>
    %60 = vector.shape_cast %59 : vector<1x1x4xf32> to vector<4xf32>
    %61 = vector.shape_cast %60 : vector<4xf32> to vector<1x1x1x4xf32>
    %62 = vector.broadcast %61 : vector<1x1x1x4xf32> to vector<1x16x16x4xf32>
    %63 = arith.mulf %58, %62 : vector<1x16x16x4xf32>
    %64 = arith.addf %57, %63 : vector<1x16x16x4xf32>
    %65 = vector.extract_strided_slice %7 {offsets = [0, 2, 0, 0], sizes = [1, 16, 16, 4], strides = [1, 1, 1, 1]} : vector<1x18x16x4xf32> to vector<1x16x16x4xf32>
    %c2_38 = arith.constant 2 : index
    %c2_39 = arith.constant 2 : index
    %c0_40 = arith.constant 0 : index
    %66 = vector.load %arg2[%c2_38, %c2_39, %c0_40] : memref<3x3x4xf32, #tpu.memory_space<vmem>>, vector<1x1x4xf32>
    %67 = vector.shape_cast %66 : vector<1x1x4xf32> to vector<4xf32>
    %68 = vector.shape_cast %67 : vector<4xf32> to vector<1x1x1x4xf32>
    %69 = vector.broadcast %68 : vector<1x1x1x4xf32> to vector<1x16x16x4xf32>
    %70 = arith.mulf %65, %69 : vector<1x16x16x4xf32>
    %71 = arith.addf %64, %70 : vector<1x16x16x4xf32>
    %c0_41 = arith.constant 0 : index
    %c0_42 = arith.constant 0 : index
    %c0_43 = arith.constant 0 : index
    %72 = vector.load %arg3[%c0_41, %c0_42, %c0_43] : memref<1x1x4xf32, #tpu.memory_space<vmem>>, vector<1x1x4xf32>
    %73 = vector.shape_cast %72 : vector<1x1x4xf32> to vector<4xf32>
    %74 = vector.shape_cast %73 : vector<4xf32> to vector<1x1x1x4xf32>
    %75 = vector.broadcast %74 : vector<1x1x1x4xf32> to vector<1x16x16x4xf32>
    %76 = arith.addf %71, %75 : vector<1x16x16x4xf32>
    %cst_44 = arith.constant 5.000000e-01 : f32
    %77 = vector.broadcast %cst_44 : f32 to vector<1x16x16x4xf32>
    %78 = arith.mulf %77, %76 : vector<1x16x16x4xf32>
    %cst_45 = arith.constant 0.707106769 : f32
    %79 = vector.broadcast %cst_45 : f32 to vector<1x16x16x4xf32>
    %80 = arith.mulf %76, %79 : vector<1x16x16x4xf32>
    %81 = math.erf %80 : vector<1x16x16x4xf32>
    %cst_46 = arith.constant 1.000000e+00 : f32
    %82 = vector.broadcast %cst_46 : f32 to vector<1x16x16x4xf32>
    %83 = arith.addf %82, %81 : vector<1x16x16x4xf32>
    %84 = arith.mulf %78, %83 : vector<1x16x16x4xf32>
    %85 = arith.addf %84, %0 : vector<1x16x16x4xf32>
    %c0_47 = arith.constant 0 : index
    %c0_48 = arith.constant 0 : index
    %c0_49 = arith.constant 0 : index
    %c0_50 = arith.constant 0 : index
    %86 = vector.load %arg4[%c0_47, %c0_48, %c0_49, %c0_50] : memref<1x16x16x4xf32, #tpu.memory_space<vmem>>, vector<1x16x16x4xf32>
    tpu.vector_store %arg4[%c0_47, %c0_48, %c0_49, %c0_50], %85 {strides = array<i32>} : memref<1x16x16x4xf32, #tpu.memory_space<vmem>>, vector<1x16x16x4xf32>,
    return
  }
  func.func @transform_0(%arg0: i32) -> (i32, i32, i32, i32) {
    %c0_i32 = arith.constant 0 : i32
    %c0_i32_0 = arith.constant 0 : i32
    %c0_i32_1 = arith.constant 0 : i32
    %c0_i32_2 = arith.constant 0 : i32
    return %arg0, %c0_i32, %c0_i32_0, %c0_i32_1 : i32, i32, i32, i32
  }
  func.func @transform_1(%arg0: i32) -> (i32, i32, i32) {
    %c0_i32 = arith.constant 0 : i32
    %c0_i32_0 = arith.constant 0 : i32
    %c0_i32_1 = arith.constant 0 : i32
    %c0_i32_2 = arith.constant 0 : i32
    return %c0_i32, %c0_i32_0, %c0_i32_1 : i32, i32, i32
  }
  func.func @transform_2(%arg0: i32) -> (i32, i32, i32) {
    %c0_i32 = arith.constant 0 : i32
    %c0_i32_0 = arith.constant 0 : i32
    %c0_i32_1 = arith.constant 0 : i32
    %c0_i32_2 = arith.constant 0 : i32
    return %c0_i32, %c0_i32_0, %c0_i32_1 : i32, i32, i32
  }
  func.func @transform_3(%arg0: i32) -> (i32, i32, i32, i32) {
    %c0_i32 = arith.constant 0 : i32
    %c0_i32_0 = arith.constant 0 : i32
    %c0_i32_1 = arith.constant 0 : i32
    %c0_i32_2 = arith.constant 0 : i32
    return %arg0, %c0_i32, %c0_i32_0, %c0_i32_1 : i32, i32, i32, i32
  }
}

</mosaic_0001>

<bundles_post_ra>
// kernel: tpu_custom_call.1
= control target key start
LH: loop header
LB: loop body
LE: loop exit
PB: predicated region body
PF: predicated region fallthrough
CT: control target
= control target key end

     0   :  { %s2496_s12 = smov 0   ;;  %s4468_s0 = inlined_call_operand.vmem [shape: f32[2,16,16,4], index: 0, kind: input, shape index: {}]   ;;  %s4469_s1 = inlined_call_operand.vmem [shape: f32[3,3,4], index: 1, kind: input, shape index: {}]   ;;  %s4470_s2 = inlined_call_operand.vmem [shape: f32[1,1,4], index: 2, kind: input, shape index: {}]   ;;  %s4471_s3 = inlined_call_operand.vmem [shape: f32[2,16,16,4], index: 3, kind: output, shape index: {}]  }
   0x1 LB: > { %s2345_s13 = sadd.s32 4294967295, %s2473_s12   ;;  %p2349_p0 = scmp.ge.s32.totalorder %s2473_s12, 1  ;;  %s2473_s12 = sphi %s2496_s12, %s13_s12  }
   0x2   : > { %p137_p1 = scmp.lt.s32.totalorder %s2473_s12, 3 }
   0x4   : > { %p138_p2 = pnand %p2349_p0, %p137_p1 }
   0x6   : > { %141 = sbr.rel (%p138_p2) target bundleno = 423 (0x1a7), region = 32 }
   0xd   : > { %vm203_vm0 = vcmask 31744   ;;  %vm206_vm1 = vcmask 25600   ;;  %p2506_p3 = scmp.lt.s32.totalorder %s2345_s13, 1  ;;  %v2475_v0 = vmov 0.0   ;;  %v2590_v4 = vld [vmem:[%s4469_s1 + $0x1] ss:$0 sm:$0xff] }
   0xe   : > { %204 = vst.msk [vmem:[#allocation2] sm:$0xff] %vm203_vm0, %v2475_v0  ;;  %205 = vst.msk [vmem:[#allocation2 + $0x8] sm:$0xff] %vm203_vm0, %v2475_v0  ;;  %v2610_v8 = vld [vmem:[%s4469_s1 + $0x2] ss:$0 sm:$0xff]  ;;  %v2640_v15 = vld [vmem:[%s4469_s1] ss:$0 sm:$0xff] }
   0xf   : > { %208 = vst.msk [vmem:[#allocation2 + $0x18] sm:$0xff] %vm203_vm0, %v2475_v0  ;;  %209 = vst.msk [vmem:[#allocation2 + $0x20] sm:$0xff] %vm203_vm0, %v2475_v0  ;;  %s4579_s13 = smov (!%p2506_p3, %s2345_s13), 1  ;;  %v2660_v19 = vld [vmem:[%s4469_s1 + $0x5] ss:$0 sm:$0xff]  ;;  %vm516_vm2 = vcmask 1046528  }
  0x10   : > { %211 = vst.msk [vmem:[#allocation2 + $0x30] sm:$0xff] %vm203_vm0, %v2475_v0  ;;  %212 = vst.msk [vmem:[#allocation2 + $0x38] sm:$0xff] %vm203_vm0, %v2475_v0  ;;  %s2372_s15 = sshll.u32 %s4579_s13, 8  ;;  %v2665_v20 = vld [vmem:[%s4469_s1 + $0x6] ss:$0 sm:$0xff]  ;;  %vm762_vm3 = vcmask 1045504  }
  0x11   : > { %214 = vst.msk [vmem:[#allocation2 + $0x48] sm:$0xff] %vm203_vm0, %v2475_v0  ;;  %215 = vst.msk [vmem:[#allocation2 + $0x50] sm:$0xff] %vm203_vm0, %v2475_v0  ;;  %s2576_s18 = scalar_lea.vmem %s4468_s0, %s2372_s15  ;;  %v2688_v25 = vld [vmem:[%s4469_s1 + $0x9] ss:$0 sm:$0xff]  ;;  %v2711_v30 = vld [vmem:[%s4469_s1 + $0xa] ss:$0 sm:$0xff]  ;;  %s3091_s17 = scalar_lea.vmem %s4471_s3, %s2372_s15 }
  0x12   : > { %217 = vst.msk [vmem:[#allocation2 + $0x60] sm:$0xff] %vm203_vm0, %v2475_v0  ;;  %218 = vst.msk [vmem:[#allocation2 + $0x68] sm:$0xff] %vm203_vm0, %v2475_v0  ;;  %v2579_v1 = vld [vmem:[%s2576_s18] sm:$0xff]  ;;  %v2582_v2 = vld [vmem:[%s2576_s18 + $0x8] sm:$0xff] }
  0x13   : > { %220 = vst.msk [vmem:[#allocation2 + $0x78] sm:$0xff] %vm203_vm0, %v2475_v0  ;;  %221 = vst.msk [vmem:[#allocation2 + $0x80] sm:$0xff] %vm203_vm0, %v2475_v0  ;;  %v2585_v3 = vld [vmem:[%s2576_s18 + $0x10] sm:$0xff]  ;;  %v2599_v5 = vld [vmem:[%s2576_s18 + $0x18] sm:$0xff] }
  0x14   : > { %223 = vst.msk [vmem:[#allocation2 + $0x90] sm:$0xff] %vm203_vm0, %v2475_v0  ;;  %224 = vst.msk [vmem:[#allocation2 + $0x98] sm:$0xff] %vm203_vm0, %v2475_v0  ;;  %v2602_v6 = vld [vmem:[%s2576_s18 + $0x20] sm:$0xff]  ;;  %v2605_v7 = vld [vmem:[%s2576_s18 + $0x28] sm:$0xff] }
  0x15   : > { %226 = vst.msk [vmem:[#allocation2 + $0xa8] sm:$0xff] %vm203_vm0, %v2475_v0  ;;  %227 = vst.msk [vmem:[#allocation2 + $0xb0] sm:$0xff] %vm203_vm0, %v2475_v0  ;;  %v293_v9 = vld [vmem:[#allocation2 + $0x8] sm:$0xff]  ;;  %v2619_v10 = vld [vmem:[%s2576_s18 + $0x30] sm:$0xff] }
  0x16   : > { %229 = vst.msk [vmem:[#allocation2 + $0xc0] sm:$0xff] %vm203_vm0, %v2475_v0  ;;  %230 = vst.msk [vmem:[#allocation2 + $0xc8] sm:$0xff] %vm203_vm0, %v2475_v0  ;;  %v2622_v11 = vld [vmem:[%s2576_s18 + $0x38] sm:$0xff]  ;;  %v2629_v12 = vld [vmem:[%s2576_s18 + $0x40] sm:$0xff]  ;;  %v2683_v24 = vmul.f32 %v2590_v4, %v293_v9  ;;  %v2706_v29 = vmul.f32 %v2610_v8, %v293_v9  ;;  %v2739_v37 = vmul.f32 %v2640_v15, %v293_v9 }
  0x17   : > { %232 = vst.msk [vmem:[#allocation2 + $0xd8] sm:$0xff] %vm203_vm0, %v2475_v0  ;;  %233 = vst.msk [vmem:[#allocation2 + $0xe0] sm:$0xff] %vm203_vm0, %v2475_v0  ;;  %v2632_v13 = vld [vmem:[%s2576_s18 + $0x48] sm:$0xff]  ;;  %v2635_v14 = vld [vmem:[%s2576_s18 + $0x50] sm:$0xff] }
  0x18   : > { %235 = vst.msk [vmem:[#allocation2 + $0xf0] sm:$0xff] %vm203_vm0, %v2475_v0  ;;  %236 = vst.msk [vmem:[#allocation2 + $0xf8] sm:$0xff] %vm203_vm0, %v2475_v0  ;;  %v2649_v16 = vld [vmem:[%s2576_s18 + $0x58] sm:$0xff]  ;;  %v2652_v17 = vld [vmem:[%s2576_s18 + $0x60] sm:$0xff] }
  0x19   : > { %238 = vst.msk [vmem:[#allocation2 + $0x108] sm:$0xff] %vm203_vm0, %v2475_v0  ;;  %239 = vst.msk [vmem:[#allocation2 + $0x110] sm:$0xff] %vm203_vm0, %v2475_v0  ;;  %v2655_v18 = vld [vmem:[%s2576_s18 + $0x68] sm:$0xff]  ;;  %v2674_v21 = vld [vmem:[%s2576_s18 + $0x70] sm:$0xff] }
  0x1a   : > { %241 = vst.msk [vmem:[#allocation2 + $0x120] sm:$0xff] %vm203_vm0, %v2475_v0  ;;  %242 = vst.msk [vmem:[#allocation2 + $0x128] sm:$0xff] %vm203_vm0, %v2475_v0  ;;  %v2677_v22 = vld [vmem:[%s2576_s18 + $0x78] sm:$0xff]  ;;  %v2680_v23 = vld [vmem:[%s2576_s18 + $0x80] sm:$0xff] }
  0x1b   : > { %244 = vst.msk [vmem:[#allocation2 + $0x138] sm:$0xff] %vm203_vm0, %v2475_v0  ;;  %245 = vst.msk [vmem:[#allocation2 + $0x140] sm:$0xff] %vm203_vm0, %v2475_v0  ;;  %v2697_v26 = vld [vmem:[%s2576_s18 + $0x88] sm:$0xff]  ;;  %v2700_v27 = vld [vmem:[%s2576_s18 + $0x90] sm:$0xff] }
  0x1c   : > { %247 = vst.msk [vmem:[#allocation2 + $0x150] sm:$0xff] %vm203_vm0, %v2475_v0  ;;  %248 = vst.msk [vmem:[#allocation2 + $0x158] sm:$0xff] %vm203_vm0, %v2475_v0  ;;  %v2703_v28 = vld [vmem:[%s2576_s18 + $0x98] sm:$0xff]  ;;  %v2720_v31 = vld [vmem:[%s2576_s18 + $0xa0] sm:$0xff] }
  0x1d   : > { %250 = vst.msk [vmem:[#allocation2 + $0x168] sm:$0xff] %vm203_vm0, %v2475_v0  ;;  %251 = vst.msk [vmem:[#allocation2 + $0x170] sm:$0xff] %vm203_vm0, %v2475_v0  ;;  %v2723_v32 = vld [vmem:[%s2576_s18 + $0xa8] sm:$0xff]  ;;  %v2726_v33 = vld [vmem:[%s2576_s18 + $0xb0] sm:$0xff] }
  0x1e   : > { %253 = vst.msk [vmem:[#allocation2 + $0x180] sm:$0xff] %vm203_vm0, %v2475_v0  ;;  %254 = vst.msk [vmem:[#allocation2 + $0x188] sm:$0xff] %vm203_vm0, %v2475_v0  ;;  %v2751_v43 = vld [vmem:[%s2576_s18 + $0xb8] sm:$0xff]  ;;  %v2757_v45 = vld [vmem:[%s4469_s1 + $0x4] ss:$0 sm:$0xff] }
  0x1f   : > { %256 = vst.msk [vmem:[#allocation2 + $0x198] sm:$0xff] %vm203_vm0, %v2475_v0  ;;  %257 = vst.msk [vmem:[#allocation2 + $0x1a0] sm:$0xff] %vm203_vm0, %v2475_v0  ;;  %v2766_v47 = vld [vmem:[%s4469_s1 + $0x8] ss:$0 sm:$0xff] }
  0x20   : > { %207 = vst.msk [vmem:[#allocation2 + $0x10] sm:$0x3] %vm206_vm1, %v2475_v0  ;;  %210 = vst.msk [vmem:[#allocation2 + $0x28] sm:$0x3] %vm206_vm1, %v2475_v0 }
  0x21   : > { %213 = vst.msk [vmem:[#allocation2 + $0x40] sm:$0x3] %vm206_vm1, %v2475_v0  ;;  %216 = vst.msk [vmem:[#allocation2 + $0x58] sm:$0x3] %vm206_vm1, %v2475_v0 }
  0x22   : > { %219 = vst.msk [vmem:[#allocation2 + $0x70] sm:$0x3] %vm206_vm1, %v2475_v0  ;;  %222 = vst.msk [vmem:[#allocation2 + $0x88] sm:$0x3] %vm206_vm1, %v2475_v0 }
  0x23   : > { %225 = vst.msk [vmem:[#allocation2 + $0xa0] sm:$0x3] %vm206_vm1, %v2475_v0  ;;  %228 = vst.msk [vmem:[#allocation2 + $0xb8] sm:$0x3] %vm206_vm1, %v2475_v0 }
  0x24   : > { %231 = vst.msk [vmem:[#allocation2 + $0xd0] sm:$0x3] %vm206_vm1, %v2475_v0  ;;  %234 = vst.msk [vmem:[#allocation2 + $0xe8] sm:$0x3] %vm206_vm1, %v2475_v0 }
  0x25   : > { %237 = vst.msk [vmem:[#allocation2 + $0x100] sm:$0x3] %vm206_vm1, %v2475_v0  ;;  %240 = vst.msk [vmem:[#allocation2 + $0x118] sm:$0x3] %vm206_vm1, %v2475_v0 }
  0x26   : > { %243 = vst.msk [vmem:[#allocation2 + $0x130] sm:$0x3] %vm206_vm1, %v2475_v0  ;;  %246 = vst.msk [vmem:[#allocation2 + $0x148] sm:$0x3] %vm206_vm1, %v2475_v0 }
  0x27   : > { %249 = vst.msk [vmem:[#allocation2 + $0x160] sm:$0x3] %vm206_vm1, %v2475_v0  ;;  %252 = vst.msk [vmem:[#allocation2 + $0x178] sm:$0x3] %vm206_vm1, %v2475_v0 }
  0x28   : > { %255 = vst.msk [vmem:[#allocation2 + $0x190] sm:$0x3] %vm206_vm1, %v2475_v0  ;;  %258 = vst.msk [vmem:[#allocation2 + $0x1a8] sm:$0x3] %vm206_vm1, %v2475_v0 }
  0x29   : > { %260 = vst.msk [vmem:[#allocation2 + $0x19] sm:$0xff] %vm203_vm0, %v2579_v1  ;;  %261 = vst.msk [vmem:[#allocation2 + $0x21] sm:$0xff] %vm203_vm0, %v2582_v2 }
  0x2a   : > { %262 = vst.msk [vmem:[#allocation2 + $0x31] sm:$0xff] %vm203_vm0, %v2585_v3  ;;  %4505 = vst [vmem:[#allocation3_spill] sm:$0xff] %v2599_v5 }
  0x2b   : > { %4506 = vst [vmem:[#allocation4_spill] sm:$0xff] %v2602_v6  ;;  %4507 = vst [vmem:[#allocation5_spill] sm:$0xff] %v2605_v7 }
  0x2c   : > { %263 = vst.msk [vmem:[#allocation2 + $0x39] sm:$0xff] %vm203_vm0, %v2599_v5  ;;  %264 = vst.msk [vmem:[#allocation2 + $0x49] sm:$0xff] %vm203_vm0, %v2602_v6 }
  0x2d   : > { %265 = vst.msk [vmem:[#allocation2 + $0x51] sm:$0xff] %vm203_vm0, %v2605_v7  ;;  %4508 = vst [vmem:[#allocation6_spill] sm:$0xff] %v2619_v10  ;;  %v4537_v7 = vrot.slane %v2706_v29, 2 }
  0x2e   : > { %4509 = vst [vmem:[#allocation7_spill] sm:$0xff] %v2622_v11  ;;  %266 = vst.msk [vmem:[#allocation2 + $0x61] sm:$0xff] %vm203_vm0, %v2619_v10  ;;  %v4536_v10 = vrot.slane %v2683_v24, 1 }
  0x2f   : > { %267 = vst.msk [vmem:[#allocation2 + $0x69] sm:$0xff] %vm203_vm0, %v2622_v11  ;;  %4510 = vst [vmem:[#allocation8_spill] sm:$0xff] %v2629_v12 }
  0x30   : > { %4511 = vst [vmem:[#allocation9_spill] sm:$0xff] %v2632_v13  ;;  %4512 = vst [vmem:[#allocation10_spill] sm:$0xff] %v2635_v14  ;;  %v295_v34 = vld [vmem:[#allocation2 + $0x18] sm:$0xff]  ;;  %v2728_v35 = vld [vmem:[#allocation2 + $0x20] sm:$0xff]  ;;  %v4538_v5 = vmov %v4536_v10 }
  0x31   : > { %268 = vst.msk [vmem:[#allocation2 + $0x79] sm:$0xff] %vm203_vm0, %v2629_v12  ;;  %269 = vst.msk [vmem:[#allocation2 + $0x81] sm:$0xff] %vm203_vm0, %v2632_v13  ;;  %v2730_v36 = vld [vmem:[#allocation2 + $0x30] sm:$0xff]  ;;  %v982_v40 = vmul.f32 %v2660_v19, %v295_v34  ;;  %v2747_v41 = vmul.f32 %v2660_v19, %v2728_v35  ;;  %v1227_v42 = vmul.f32 %v2665_v20, %v295_v34 }
  0x32   : > { %270 = vst.msk [vmem:[#allocation2 + $0x91] sm:$0xff] %vm203_vm0, %v2635_v14  ;;  %4513 = vst [vmem:[#allocation11_spill] sm:$0xff] %v2649_v16  ;;  %v2761_v46 = vmul.f32 %v2665_v20, %v2728_v35  ;;  %v1542_v48 = vmul.f32 %v2688_v25, %v2730_v36  ;;  %v1787_v53 = vmul.f32 %v2711_v30, %v2730_v36 }
  0x33   : > { %4514 = vst [vmem:[#allocation12_spill] sm:$0xff] %v2652_v17  ;;  %4515 = vst [vmem:[#allocation13_spill] sm:$0xff] %v2655_v18  ;;  %v2741_v38 = vld [vmem:[#allocation2 + $0x38] sm:$0xff]  ;;  %v1078_v50 = vrot.slane %v982_v40, 1  ;;  %v4473_v51 = vrot.slane %v2747_v41, 1  ;;  %v1323_v52 = vrot.slane %v1227_v42, 2  ;;  %v2786_v58 = vmul.f32 %v2757_v45, %v295_v34 }
  0x34   : > { %271 = vst.msk [vmem:[#allocation2 + $0x99] sm:$0xff] %vm203_vm0, %v2649_v16  ;;  %272 = vst.msk [vmem:[#allocation2 + $0xa9] sm:$0xff] %vm203_vm0, %v2652_v17  ;;  %v2772_v49 = vmul.f32 %v2688_v25, %v2741_v38  ;;  %v4472_v54 = vrot.slane %v2761_v46, 2  ;;  %v1638_v55 = vrot.slane %v1542_v48, 1  ;;  %v2783_v57 = vmul.f32 %v2711_v30, %v2741_v38 }
  0x35   : > { %273 = vst.msk [vmem:[#allocation2 + $0xb1] sm:$0xff] %vm203_vm0, %v2655_v18  ;;  %4516 = vst [vmem:[#allocation14_spill] sm:$0xff] %v2674_v21  ;;  %v2791_v59 = vsel %vm516_vm2, %v1078_v50, %v4473_v51  ;;  %v2795_v60 = vmul.f32 %v2766_v47, %v2730_v36  ;;  %v1883_v61 = vrot.slane %v1787_v53, 2  ;;  %v2805_v0 = vmul.f32 %v2757_v45, %v2728_v35  ;;  %v2827_v53 = vld [vmem:[%s2576_s18 + $0xc8] sm:$0xff] }
  0x36   : > { %4517 = vst [vmem:[#allocation15_spill] sm:$0xff] %v2677_v22  ;;  %4518 = vst [vmem:[#allocation16_spill] sm:$0xff] %v2680_v23  ;;  %v4474_v56 = vrot.slane %v2772_v49, 1  ;;  %v2800_v62 = vsel %vm762_vm3, %v1323_v52, %v4472_v54  ;;  %v2809_v9 = vmul.f32 %v2766_v47, %v2741_v38  ;;  %v423_v40 = vmul.f32 %v2590_v4, %v295_v34  ;;  %v2824_v52 = vld [vmem:[%s2576_s18 + $0xc0] sm:$0xff]  ;;  %v2830_v54 = vld [vmem:[%s2576_s18 + $0xd0] sm:$0xff] }
  0x37   : > { %274 = vst.msk [vmem:[#allocation2 + $0xc1] sm:$0xff] %vm203_vm0, %v2674_v21  ;;  %275 = vst.msk [vmem:[#allocation2 + $0xc9] sm:$0xff] %vm203_vm0, %v2677_v22  ;;  %v2814_v42 = vmul.f32 %v2590_v4, %v2728_v35  ;;  %v2817_v48 = vmul.f32 %v2610_v8, %v295_v34  ;;  %v2821_v50 = vmul.f32 %v2610_v8, %v2728_v35 }
  0x38   : > { %276 = vst.msk [vmem:[#allocation2 + $0xd9] sm:$0xff] %vm203_vm0, %v2680_v23  ;;  %4519 = vst [vmem:[#allocation17_spill] sm:$0xff] %v2697_v26  ;;  %v2835_v51 = vsel %vm516_vm2, %v1638_v55, %v4474_v56  ;;  %v353_v44 = vmul.f32 %v2640_v15, %v295_v34  ;;  %v2840_v39 = vmul.f32 %v2660_v19, %v2730_v36  ;;  %v2853_v34 = vld [vmem:[%s2576_s18 + $0xd8] sm:$0xff]  ;;  %v2856_v55 = vld [vmem:[%s2576_s18 + $0xe0] sm:$0xff] }
  0x39   : > { %4520 = vst [vmem:[#allocation18_spill] sm:$0xff] %v2700_v27  ;;  %4521 = vst [vmem:[#allocation19_spill] sm:$0xff] %v2703_v28  ;;  %v2844_v63 = vmul.f32 %v2660_v19, %v2741_v38  ;;  %v2859_v56 = vld [vmem:[%s2576_s18 + $0xe8] sm:$0xff] }
  0x3a   : > { %277 = vst.msk [vmem:[#allocation2 + $0xe1] sm:$0xff] %vm203_vm0, %v2697_v26  ;;  %278 = vst.msk [vmem:[#allocation2 + $0xf1] sm:$0xff] %vm203_vm0, %v2700_v27  ;;  %v2904_v26 = vld [vmem:[#allocation2 + $0x40] sm:$0x3] }
  0x3b   : > { %279 = vst.msk [vmem:[#allocation2 + $0xf9] sm:$0xff] %vm203_vm0, %v2703_v28  ;;  %4522 = vst [vmem:[#allocation20_spill] sm:$0xff] %v2720_v31  ;;  %v4535_v28 = vrot.slane %v2814_v42, 1 }
  0x3c   : > { %4523 = vst [vmem:[#allocation21_spill] sm:$0xff] %v2723_v32  ;;  %4524 = vst [vmem:[#allocation22_spill] sm:$0xff] %v2726_v33 }
  0x3d   : > { %280 = vst.msk [vmem:[#allocation2 + $0x109] sm:$0xff] %vm203_vm0, %v2720_v31  ;;  %281 = vst.msk [vmem:[#allocation2 + $0x111] sm:$0xff] %vm203_vm0, %v2723_v32  ;;  %v522_v32 = vrot.slane %v423_v40, 1 }
  0x3e   : > { %282 = vst.msk [vmem:[#allocation2 + $0x121] sm:$0xff] %vm203_vm0, %v2726_v33  ;;  %4525 = vst [vmem:[#allocation23_spill] sm:$0xff] %v2751_v43 }
  0x3f   : > { %283 = vst.msk [vmem:[#allocation2 + $0x129] sm:$0xff] %vm203_vm0, %v2751_v43  ;;  %4526 = vst [vmem:[#allocation24_spill] sm:$0xff] %v2824_v52  ;;  %v4532_v43 = vrot.slane %v2783_v57, 2  ;;  %v524_v27 = vsel %vm516_vm2, %v522_v32, %v4535_v28  ;;  %v2907_v28 = vld [vmem:[#allocation2 + $0x48] sm:$0xff] }
  0x40   : > { %4527 = vst [vmem:[#allocation25_spill] sm:$0xff] %v2827_v53  ;;  %4528 = vst [vmem:[#allocation26_spill] sm:$0xff] %v2830_v54 }
  0x41   : > { %284 = vst.msk [vmem:[#allocation2 + $0x139] sm:$0xff] %vm203_vm0, %v2824_v52  ;;  %285 = vst.msk [vmem:[#allocation2 + $0x141] sm:$0xff] %vm203_vm0, %v2827_v53  ;;  %v2864_v33 = vsel %vm762_vm3, %v1883_v61, %v4532_v43  ;;  %v2869_v53 = vmul.f32 %v2665_v20, %v2730_v36  ;;  %v2881_v43 = vld [vmem:[%s2576_s18 + $0xf8] sm:$0xff]  ;;  %v768_v61 = vrot.slane %v2817_v48, 2  ;;  %v1083_v52 = vrot.slane %v2840_v39, 1 }
  0x42   : > { %286 = vst.msk [vmem:[#allocation2 + $0x151] sm:$0xff] %vm203_vm0, %v2830_v54  ;;  %4529 = vst [vmem:[#allocation27_spill] sm:$0xff] %v2853_v34  ;;  %v2878_v54 = vld [vmem:[%s2576_s18 + $0xf0] sm:$0xff]  ;;  %v915_v48 = vmul.f32 %v2757_v45, %v2730_v36  ;;  %v2898_v39 = vmul.f32 %v2665_v20, %v2741_v38 }
  0x43   : > { %4530 = vst [vmem:[#allocation28_spill] sm:$0xff] %v2856_v55  ;;  %4531 = vst [vmem:[#allocation29_spill] sm:$0xff] %v2859_v56  ;;  %v1328_v31 = vrot.slane %v2869_v53, 2  ;;  %v1544_v53 = vmul.f32 %v2688_v25, %v2904_v26 }
  0x44   : > { %287 = vst.msk [vmem:[#allocation2 + $0x159] sm:$0xff] %vm203_vm0, %v2853_v34  ;;  %288 = vst.msk [vmem:[#allocation2 + $0x169] sm:$0xff] %vm203_vm0, %v2856_v55  ;;  %v292_v55 = vld [vmem:[#allocation2] sm:$0xff]  ;;  %v297_v34 = vld [vmem:[#allocation2 + $0x28] sm:$0x3] }
  0x45   : > { %289 = vst.msk [vmem:[#allocation2 + $0x171] sm:$0xff] %vm203_vm0, %v2859_v56  ;;  %4533 = vst [vmem:[#allocation30_spill] sm:$0xff] %v2878_v54  ;;  %v294_v56 = vld [vmem:[#allocation2 + $0x10] sm:$0x3]  ;;  %v351_v40 = vmul.f32 %v2640_v15, %v292_v55  ;;  %v984_v22 = vmul.f32 %v2660_v19, %v297_v34  ;;  %v1229_v21 = vmul.f32 %v2665_v20, %v297_v34  ;;  %v1641_v11 = vrot.slane %v1544_v53, 1 }
  0x46   : > { %4534 = vst [vmem:[#allocation31_spill] sm:$0xff] %v2881_v43  ;;  %290 = vst.msk [vmem:[#allocation2 + $0x181] sm:$0xff] %vm203_vm0, %v2878_v54  ;;  %v666_v54 = vmul.f32 %v2610_v8, %v292_v55  ;;  %v422_v23 = vmul.f32 %v2590_v4, %v294_v56  ;;  %v668_v32 = vmul.f32 %v2610_v8, %v294_v56 }
  0x47   : > { %291 = vst.msk [vmem:[#allocation2 + $0x189] sm:$0xff] %vm203_vm0, %v2881_v43  ;;  %v420_v43 = vmul.f32 %v2590_v4, %v292_v55  ;;  %v1789_v55 = vmul.f32 %v2711_v30, %v2904_v26  ;;  %v1081_v13 = vrot.slane %v984_v22, 1  ;;  %v1326_v12 = vrot.slane %v1229_v21, 2 }
  0x48   : > { %v763_v17 = vrot.slane %v666_v54, 2  ;;  %v520_v16 = vrot.slane %v422_v23, 1  ;;  %v766_v14 = vrot.slane %v668_v32, 2  ;;  %v1545_v23 = vmul.f32 %v2688_v25, %v2907_v28 }
  0x49   : > { %v517_v18 = vrot.slane %v420_v43, 1  ;;  %v2927_v43 = vld [vmem:[#allocation2 + $0x50] sm:$0xff]  ;;  %v4539_v32 = vmov %v4537_v7  ;;  %v1886_v24 = vrot.slane %v1789_v55, 2  ;;  %v631_v53 = vadd.f32 %v524_v27, %v353_v44 }
  0x4a   : > { %v765_v6 = vsel %vm762_vm3, %v763_v17, %v4537_v7  ;;  %v521_v54 = vsel %vm516_vm2, %v4538_v5, %v520_v16  ;;  %v4540_v7 = vrot.slane %v2747_v41, 1  ;;  %v4541_v5 = vrot.slane %v2761_v46, 2 }
  0x4b   : > { %v519_v56 = vsel %vm516_vm2, %v517_v18, %v4536_v10  ;;  %v630_v21 = vadd.f32 %v521_v54, %v2739_v37  ;;  %v767_v10 = vsel %vm762_vm3, %v4539_v32, %v766_v14  ;;  %v1475_v18 = vmul.f32 %v2766_v47, %v2907_v28 }
  0x4c   : > { %v629_v22 = vadd.f32 %v519_v56, %v351_v40  ;;  %v1082_v17 = vsel %vm516_vm2, %v4540_v7, %v1081_v13  ;;  %v1327_v16 = vsel %vm762_vm3, %v4541_v5, %v1326_v12  ;;  %v4542_v37 = vrot.slane %v2772_v49, 1 }
  0x4d   : > { %v876_v56 = vadd.f32 %v767_v10, %v630_v21  ;;  %v4543_v14 = vrot.slane %v2821_v50, 2  ;;  %v1329_v41 = vrot.slane %v2898_v39, 2  ;;  %v2950_v13 = vmul.f32 %v2688_v25, %v2927_v43 }
  0x4e   : > { %v875_v40 = vadd.f32 %v765_v6, %v629_v22  ;;  %v1642_v29 = vsel %vm516_vm2, %v4542_v37, %v1641_v11  ;;  %v1643_v12 = vrot.slane %v1545_v23, 1  ;;  %v1790_v44 = vmul.f32 %v2711_v30, %v2907_v28 }
  0x4f   : > { %v770_v54 = vsel %vm762_vm3, %v768_v61, %v4543_v14  ;;  %v946_v6 = vadd.f32 %v2805_v0, %v876_v56  ;;  %v1791_v11 = vmul.f32 %v2711_v30, %v2927_v43  ;;  %v4544_v46 = vrot.slane %v2783_v57, 2  ;;  %v2978_v14 = vld [vmem:[#allocation2 + $0x58] sm:$0x3] }
  0x50   : > { %v877_v32 = vadd.f32 %v770_v54, %v631_v53  ;;  %v945_v27 = vadd.f32 %v2786_v58, %v875_v40  ;;  %v4545_v39 = vrot.slane %v2844_v63, 1  ;;  %v1644_v23 = vrot.slane %v2950_v13, 1 }
  0x51   : > { %v1887_v49 = vsel %vm762_vm3, %v4544_v46, %v1886_v24  ;;  %v1191_v0 = vadd.f32 %v1082_v17, %v946_v6  ;;  %v1888_v22 = vrot.slane %v1790_v44, 2  ;;  %v1889_v21 = vrot.slane %v1791_v11, 2 }
  0x52   : > { %v947_v61 = vadd.f32 %v915_v48, %v877_v32  ;;  %v1085_v55 = vsel %vm516_vm2, %v1083_v52, %v4545_v39  ;;  %v1190_v58 = vadd.f32 %v2791_v59, %v945_v27  ;;  %v1330_v7 = vsel %vm762_vm3, %v1328_v31, %v1329_v41 }
  0x53   : > { %v425_v5 = vmul.f32 %v2590_v4, %v297_v34  ;;  %v671_v57 = vmul.f32 %v2610_v8, %v297_v34  ;;  %v1436_v24 = vadd.f32 %v1327_v16, %v1191_v0  ;;  %v1645_v53 = vsel %vm516_vm2, %v1643_v12, %v1644_v23 }
  0x54   : > { %v1192_v10 = vadd.f32 %v1085_v55, %v947_v61  ;;  %v1435_v48 = vadd.f32 %v2800_v62, %v1190_v58  ;;  %v354_v52 = vmul.f32 %v2640_v15, %v2728_v35  ;;  %v987_v56 = vmul.f32 %v2660_v19, %v2904_v26 }
  0x55   : > { %v525_v59 = vrot.slane %v425_v5, 1  ;;  %v771_v17 = vrot.slane %v671_v57, 2  ;;  %v1506_v37 = vadd.f32 %v2809_v9, %v1436_v24  ;;  %v1890_v34 = vsel %vm762_vm3, %v1888_v22, %v1889_v21 }
  0x56   : > { %v1437_v40 = vadd.f32 %v1330_v7, %v1192_v10  ;;  %v1505_v31 = vadd.f32 %v2795_v60, %v1435_v48  ;;  %v1232_v62 = vmul.f32 %v2665_v20, %v2904_v26  ;;  %v4546_v35 = vrot.slane %v2814_v42, 1 }
  0x57   : > { %v916_v32 = vmul.f32 %v2757_v45, %v2741_v38  ;;  %v1086_v13 = vrot.slane %v987_v56, 1  ;;  %v1751_v12 = vadd.f32 %v1642_v29, %v1506_v37  ;;  %v4547_v27 = vrot.slane %v2821_v50, 2 }
  0x58   : > { %v1507_v16 = vadd.f32 %v1475_v18, %v1437_v40  ;;  %v526_v54 = vsel %vm516_vm2, %v4546_v35, %v525_v59  ;;  %v1750_v60 = vadd.f32 %v2835_v51, %v1505_v31  ;;  %v2994_v18 = vld [vmem:[%s4470_s2] ss:$0 sm:$0xff]  ;;  %v1331_v44 = vrot.slane %v1232_v62, 2 }
  0x59   : > { %v632_v9 = vadd.f32 %v526_v54, %v354_v52  ;;  %v772_v6 = vsel %vm762_vm3, %v4547_v27, %v771_v17  ;;  %v1547_v11 = vmul.f32 %v2688_v25, %v2978_v14  ;;  %v1792_v46 = vmul.f32 %v2711_v30, %v2978_v14 }
  0x5a   : > { %v1752_v42 = vadd.f32 %v1645_v53, %v1507_v16  ;;  %v1995_v51 = vadd.f32 %v2864_v33, %v1750_v60  ;;  %v1996_v29 = vadd.f32 %v1887_v49, %v1751_v12  ;;  %v1476_v50 = vmul.f32 %v2766_v47, %v2927_v43 }
  0x5b   : > { %v878_v61 = vadd.f32 %v772_v6, %v632_v9  ;;  %v4548_v55 = vrot.slane %v2844_v63, 1  ;;  %v1646_v0 = vrot.slane %v1547_v11, 1  ;;  %v1891_v22 = vrot.slane %v1792_v46, 2 }
  0x5c   : > { %v1997_v39 = vadd.f32 %v1890_v34, %v1752_v42  ;;  %v2034_v10 = vadd.f32 %v2994_v18, %v1995_v51  ;;  %v2035_v7 = vadd.f32 %v2994_v18, %v1996_v29  ;;  %v426_v33 = vmul.f32 %v2590_v4, %v2730_v36 }
  0x5d   : > { %v1087_v58 = vsel %vm516_vm2, %v4548_v55, %v1086_v13  ;;  %v948_v5 = vadd.f32 %v916_v32, %v878_v61  ;;  %v1332_v57 = vsel %vm762_vm3, %v1329_v41, %v1331_v44  ;;  %v355_v48 = vmul.f32 %v2640_v15, %v2730_v36  ;;  %v3035_v32 = vld [vmem:[#allocation2 + $0x68] sm:$0xff] }
  0x5e   : > { %v2036_v49 = vadd.f32 %v2994_v18, %v1997_v39  ;;  %v3016_v63 = vmul.f32 %v2590_v4, %v2741_v38  ;;  %v2098_v24 = vmul.f32 0.70710677, %v2034_v10  ;;  %v2099_v53 = vmul.f32 0.70710677, %v2035_v7 }
  0x5f   : > { %v1647_v52 = vsel %vm516_vm2, %v1644_v23, %v1646_v0  ;;  %v1892_v40 = vsel %vm762_vm3, %v1889_v21, %v1891_v22  ;;  %v2066_v59 = vmul.f32 0.5, %v2034_v10  ;;  %v1193_v56 = vadd.f32 %v1087_v58, %v948_v5  ;;  %v3029_v21 = vld [vmem:[#allocation2 + $0x60] sm:$0xff] }
  0x60   : > { %v2100_v17 = vmul.f32 0.70710677, %v2036_v49  ;;  %v527_v31 = vrot.slane %v426_v33, 1  ;;  %2383 = verf.f32 %v2098_v24  ;;  %v528_v41 = vrot.slane %v3016_v63, 1 }
  0x61   : > { %v672_v37 = vmul.f32 %v2610_v8, %v2730_v36  ;;  %v3025_v34 = vmul.f32 %v2610_v8, %v2741_v38  ;;  %v2067_v62 = vmul.f32 0.5, %v2035_v7  ;;  %2385 = verf.f32 %v2099_v53 }
  0x62   : > { %v1438_v16 = vadd.f32 %v1332_v57, %v1193_v56  ;;  %v988_v23 = vmul.f32 %v2660_v19, %v2907_v28  ;;  %2387 = verf.f32 %v2100_v17  ;;  %v529_v35 = vsel %vm516_vm2, %v527_v31, %v528_v41 }
  0x63   : > { %v773_v54 = vrot.slane %v672_v37, 2  ;;  %v774_v36 = vrot.slane %v3025_v34, 2  ;;  %v633_v60 = vadd.f32 %v529_v35, %v355_v48  ;;  %v917_v12 = vmul.f32 %v2757_v45, %v2907_v28 }
  0x64   : > { %v1508_v13 = vadd.f32 %v1476_v50, %v1438_v16  ;;  %v3041_v9 = vmul.f32 %v2660_v19, %v2927_v43  ;;  %v1088_v6 = vrot.slane %v988_v23, 1  ;;  %v1233_v42 = vmul.f32 %v2665_v20, %v2907_v28 }
  0x65   : > { %v775_v27 = vsel %vm762_vm3, %v773_v54, %v774_v36  ;;  %v3048_v44 = vmul.f32 %v2665_v20, %v2927_v43  ;;  %v1548_v29 = vmul.f32 %v2688_v25, %v3029_v21  ;;  %v3056_v39 = vmul.f32 %v2688_v25, %v3035_v32 }
  0x66   : > { %v1753_v11 = vadd.f32 %v1647_v52, %v1508_v13  ;;  %v879_v46 = vadd.f32 %v775_v27, %v633_v60  ;;  %v1089_v51 = vrot.slane %v3041_v9, 1  ;;  %v1333_v61 = vrot.slane %v1233_v42, 2 }
  0x67   : > { %v1334_v50 = vrot.slane %v3048_v44, 2  ;;  %v1793_v55 = vmul.f32 %v2711_v30, %v3029_v21  ;;  %v2068_v58 = vmul.f32 0.5, %v2036_v49  ;;  %v1648_v10 = vrot.slane %v1548_v29, 1 }
  0x68   : > { %v1998_v0 = vadd.f32 %v1892_v40, %v1753_v11  ;;  %v949_v22 = vadd.f32 %v917_v12, %v879_v46  ;;  %v1090_v7 = vsel %vm516_vm2, %v1088_v6, %v1089_v51  ;;  %v1477_v5 = vmul.f32 %v2766_v47, %v3029_v21  ;;  %v3096_v46 = vld [vmem:[#allocation2 + $0x70] sm:$0x3] }
  0x69   : > { %v1649_v33 = vrot.slane %v3056_v39, 1  ;;  %v3068_v57 = vmul.f32 %v2711_v30, %v3035_v32  ;;  %v1335_v49 = vsel %vm762_vm3, %v1333_v61, %v1334_v50  ;;  %v428_v53 = vmul.f32 %v2590_v4, %v2904_v26 }
  0x6a   : > { %v2037_v48 = vadd.f32 %v2994_v18, %v1998_v0  ;;  %v1194_v24 = vadd.f32 %v1090_v7, %v949_v22  ;;  %v2384_v52 = vpop.eup %2383  ;;  %v1893_v40 = vrot.slane %v1793_v55, 2  ;;  %v356_v56 = vmul.f32 %v2640_v15, %v2741_v38 }
  0x6b   : > { %v1894_v17 = vrot.slane %v3068_v57, 2  ;;  %v674_v31 = vmul.f32 %v2610_v8, %v2904_v26  ;;  %v2386_v37 = vpop.eup %2385  ;;  %v2162_v34 = vadd.f32 1.0, %v2384_v52  ;;  %v1650_v35 = vsel %vm516_vm2, %v1648_v10, %v1649_v33 }
  0x6c   : > { %v2101_v16 = vmul.f32 0.70710677, %v2037_v48  ;;  %v1439_v23 = vadd.f32 %v1335_v49, %v1194_v24  ;;  %v2388_v54 = vpop.eup %2387  ;;  %v2163_v13 = vadd.f32 1.0, %v2386_v37  ;;  %v530_v60 = vrot.slane %v428_v53, 1 }
  0x6d   : > { %v776_v12 = vrot.slane %v674_v31, 2  ;;  %v918_v27 = vmul.f32 %v2757_v45, %v2927_v43  ;;  %v2194_v38 = vmul.f32 %v2162_v34, %v2066_v59  ;;  %v2164_v6 = vadd.f32 1.0, %v2388_v54 }
  0x6e   : > { %2389 = verf.f32 %v2101_v16  ;;  %v1509_v42 = vadd.f32 %v1477_v5, %v1439_v23  ;;  %v2195_v26 = vmul.f32 %v2163_v13, %v2067_v62  ;;  %v1895_v11 = vsel %vm762_vm3, %v1893_v40, %v1894_v17 }
  0x6f   : > { %v531_v59 = vsel %vm516_vm2, %v528_v41, %v530_v60  ;;  %v990_v29 = vmul.f32 %v2660_v19, %v2978_v14  ;;  %v2226_v61 = vadd.f32 %v2194_v38, %v2579_v1  ;;  %v2196_v55 = vmul.f32 %v2164_v6, %v2068_v58  ;;  %v3154_v38 = vld [vmem:[#allocation2 + $0x78] sm:$0xff] }
  0x70   : > { %v1754_v0 = vadd.f32 %v1650_v35, %v1509_v42  ;;  %v634_v62 = vadd.f32 %v531_v59, %v356_v56  ;;  %v2227_v22 = vadd.f32 %v2195_v26, %v2582_v2  ;;  %v777_v10 = vsel %vm762_vm3, %v774_v36, %v776_v12  ;;  %v3162_v59 = vld [vmem:[#allocation2 + $0x80] sm:$0xff] }
  0x71   : > { %v1091_v7 = vrot.slane %v990_v29, 1  ;;  %v1235_v63 = vmul.f32 %v2665_v20, %v2978_v14  ;;  %2258 = vst.msk [vmem:[%s3091_s17] sm:$0xff] %vm203_vm0, %v2226_v61  ;;  %v2228_v41 = vadd.f32 %v2196_v55, %v2585_v3  ;;  %v1550_v1 = vmul.f32 %v2688_v25, %v3096_v46 }
  0x72   : > { %v1999_v5 = vadd.f32 %v1895_v11, %v1754_v0  ;;  %v880_v24 = vadd.f32 %v777_v10, %v634_v62  ;;  %2259 = vst.msk [vmem:[%s3091_s17 + $0x8] sm:$0xff] %vm203_vm0, %v2227_v22  ;;  %v2069_v58 = vmul.f32 0.5, %v2037_v48  ;;  %v1478_v2 = vmul.f32 %v2766_v47, %v3035_v32 }
  0x73   : > { %v1336_v49 = vrot.slane %v1235_v63, 2  ;;  %v1795_v36 = vmul.f32 %v2711_v30, %v3096_v46  ;;  %2260 = vst.msk [vmem:[%s3091_s17 + $0x10] sm:$0xff] %vm203_vm0, %v2228_v41  ;;  %v1651_v52 = vrot.slane %v1550_v1, 1  ;;  %v429_v40 = vmul.f32 %v2590_v4, %v2907_v28  ;;  %v4549_v63 = vld [vmem:[#allocation3_spill] sm:$0xff] }
  0x74   : > { %v2038_v53 = vadd.f32 %v2994_v18, %v1999_v5  ;;  %v950_v3 = vadd.f32 %v918_v27, %v880_v24  ;;  %v1092_v48 = vsel %vm516_vm2, %v1089_v51, %v1091_v7  ;;  %v357_v56 = vmul.f32 %v2640_v15, %v2907_v28 }
  0x75   : > { %v3131_v31 = vmul.f32 %v2590_v4, %v2927_v43  ;;  %v675_v37 = vmul.f32 %v2610_v8, %v2907_v28  ;;  %v1337_v23 = vsel %vm762_vm3, %v1334_v50, %v1336_v49  ;;  %v1896_v35 = vrot.slane %v1795_v36, 2 }
  0x76   : > { %v2102_v34 = vmul.f32 0.70710677, %v2038_v53  ;;  %v1195_v16 = vadd.f32 %v1092_v48, %v950_v3  ;;  %v1652_v9 = vsel %vm516_vm2, %v1649_v33, %v1651_v52  ;;  %v532_v51 = vrot.slane %v429_v40, 1 }
  0x77   : > { %v533_v54 = vrot.slane %v3131_v31, 1  ;;  %v3144_v13 = vmul.f32 %v2610_v8, %v2927_v43  ;;  %v778_v12 = vrot.slane %v675_v37, 2  ;;  %v919_v44 = vmul.f32 %v2757_v45, %v3029_v21 }
  0x78   : > { %v2390_v60 = vpop.eup %2389  ;;  %2391 = verf.f32 %v2102_v34  ;;  %v1440_v28 = vadd.f32 %v1337_v23, %v1195_v16  ;;  %v991_v27 = vmul.f32 %v2660_v19, %v3029_v21  ;;  %v3158_v26 = vmul.f32 %v2660_v19, %v3035_v32 }
  0x79   : > { %v2165_v50 = vadd.f32 1.0, %v2390_v60  ;;  %v534_v39 = vsel %vm516_vm2, %v532_v51, %v533_v54  ;;  %v779_v33 = vrot.slane %v3144_v13, 2  ;;  %v1236_v11 = vmul.f32 %v2665_v20, %v3029_v21 }
  0x7a   : > { %v1510_v6 = vadd.f32 %v1478_v2, %v1440_v28  ;;  %v635_v42 = vadd.f32 %v534_v39, %v357_v56  ;;  %v1093_v55 = vrot.slane %v991_v27, 1  ;;  %v3167_v0 = vmul.f32 %v2665_v20, %v3035_v32 }
  0x7b   : > { %v2197_v29 = vmul.f32 %v2165_v50, %v2069_v58  ;;  %v780_v61 = vsel %vm762_vm3, %v778_v12, %v779_v33  ;;  %v1094_v10 = vrot.slane %v3158_v26, 1  ;;  %v1338_v7 = vrot.slane %v1236_v11, 2 }
  0x7c   : > { %v1755_v62 = vadd.f32 %v1652_v9, %v1510_v6  ;;  %v881_v22 = vadd.f32 %v780_v61, %v635_v42  ;;  %v1897_v5 = vsel %vm762_vm3, %v1894_v17, %v1896_v35  ;;  %v1339_v24 = vrot.slane %v3167_v0, 2  ;;  %v3197_v6 = vld [vmem:[#allocation2 + $0x88] sm:$0x3] }
  0x7d   : > { %v2229_v41 = vadd.f32 %v2197_v29, %v4549_v63  ;;  %v1551_v1 = vmul.f32 %v2688_v25, %v3154_v38  ;;  %v2070_v58 = vmul.f32 0.5, %v2038_v53  ;;  %v1552_v36 = vmul.f32 %v2688_v25, %v3162_v59 }
  0x7e   : > { %v2000_v49 = vadd.f32 %v1897_v5, %v1755_v62  ;;  %v951_v2 = vadd.f32 %v919_v44, %v881_v22  ;;  %v1095_v3 = vsel %vm516_vm2, %v1093_v55, %v1094_v10  ;;  %v1340_v52 = vsel %vm762_vm3, %v1338_v7, %v1339_v24  ;;  %v4550_v62 = vld [vmem:[#allocation4_spill] sm:$0xff] }
  0x7f   : > { %2261 = vst.msk [vmem:[%s3091_s17 + $0x18] sm:$0xff] %vm203_vm0, %v2229_v41  ;;  %v1796_v57 = vmul.f32 %v2711_v30, %v3154_v38  ;;  %v1797_v17 = vmul.f32 %v2711_v30, %v3162_v59  ;;  %v1653_v48 = vrot.slane %v1551_v1, 1  ;;  %v1654_v56 = vrot.slane %v1552_v36, 1 }
  0x80   : > { %v2039_v40 = vadd.f32 %v2994_v18, %v2000_v49  ;;  %v1196_v53 = vadd.f32 %v1095_v3, %v951_v2  ;;  %v431_v16 = vmul.f32 %v2590_v4, %v2978_v14  ;;  %v677_v23 = vmul.f32 %v2610_v8, %v2978_v14 }
  0x81   : > { %v1898_v37 = vrot.slane %v1796_v57, 2  ;;  %v1899_v34 = vrot.slane %v1797_v17, 2  ;;  %v1479_v13 = vmul.f32 %v2766_v47, %v3154_v38  ;;  %v358_v60 = vmul.f32 %v2640_v15, %v2927_v43 }
  0x82   : > { %v2392_v35 = vpop.eup %2391  ;;  %v2103_v9 = vmul.f32 0.70710677, %v2039_v40  ;;  %v1441_v51 = vadd.f32 %v1340_v52, %v1196_v53  ;;  %v2071_v12 = vmul.f32 0.5, %v2039_v40  ;;  %v535_v44 = vrot.slane %v431_v16, 1 }
  0x83   : > { %v2166_v28 = vadd.f32 1.0, %v2392_v35  ;;  %v781_v50 = vrot.slane %v677_v23, 2  ;;  %v1655_v27 = vsel %vm516_vm2, %v1653_v48, %v1654_v56  ;;  %v993_v14 = vmul.f32 %v2660_v19, %v3096_v46 }
  0x84   : > { %2393 = verf.f32 %v2103_v9  ;;  %v1511_v39 = vadd.f32 %v1479_v13, %v1441_v51  ;;  %v1900_v26 = vsel %vm762_vm3, %v1898_v37, %v1899_v34  ;;  %v536_v43 = vsel %vm516_vm2, %v533_v54, %v535_v44  ;;  %v3242_v13 = vld [vmem:[#allocation2 + $0x90] sm:$0xff] }
  0x85   : > { %v2198_v42 = vmul.f32 %v2166_v28, %v2070_v58  ;;  %v1238_v11 = vmul.f32 %v2665_v20, %v3096_v46  ;;  %v636_v61 = vadd.f32 %v536_v43, %v358_v60  ;;  %v782_v55 = vsel %vm762_vm3, %v779_v33, %v781_v50 }
  0x86   : > { %v1756_v29 = vadd.f32 %v1655_v27, %v1511_v39  ;;  %v1096_v0 = vrot.slane %v993_v14, 1  ;;  %v1553_v63 = vmul.f32 %v2688_v25, %v3197_v6  ;;  %v1798_v41 = vmul.f32 %v2711_v30, %v3197_v6  ;;  %v3252_v27 = vld [vmem:[#allocation2 + $0x98] sm:$0xff] }
  0x87   : > { %v2230_v22 = vadd.f32 %v2198_v42, %v4550_v62  ;;  %v1341_v7 = vrot.slane %v1238_v11, 2  ;;  %v882_v5 = vadd.f32 %v782_v55, %v636_v61  ;;  %v920_v54 = vmul.f32 %v2757_v45, %v3035_v32 }
  0x88   : > { %v2001_v31 = vadd.f32 %v1900_v26, %v1756_v29  ;;  %v1480_v1 = vmul.f32 %v2766_v47, %v3162_v59  ;;  %v1097_v33 = vsel %vm516_vm2, %v1094_v10, %v1096_v0  ;;  %v1656_v58 = vrot.slane %v1553_v63, 1  ;;  %v4551_v63 = vld [vmem:[#allocation5_spill] sm:$0xff] }
  0x89   : > { %2262 = vst.msk [vmem:[%s3091_s17 + $0x20] sm:$0xff] %vm203_vm0, %v2230_v22  ;;  %v1901_v49 = vrot.slane %v1798_v41, 2  ;;  %v432_v2 = vmul.f32 %v2590_v4, %v3029_v21  ;;  %v952_v3 = vadd.f32 %v920_v54, %v882_v5  ;;  %v3225_v52 = vmul.f32 %v2590_v4, %v3035_v32 }
  0x8a   : > { %v2040_v36 = vadd.f32 %v2994_v18, %v2001_v31  ;;  %v678_v57 = vmul.f32 %v2610_v8, %v3029_v21  ;;  %v1342_v17 = vsel %vm762_vm3, %v1339_v24, %v1341_v7  ;;  %v359_v10 = vmul.f32 %v2640_v15, %v3029_v21 }
  0x8b   : > { %v537_v40 = vrot.slane %v432_v2, 1  ;;  %v3234_v53 = vmul.f32 %v2610_v8, %v3035_v32  ;;  %v1197_v37 = vadd.f32 %v1097_v33, %v952_v3  ;;  %v1657_v16 = vsel %vm516_vm2, %v1654_v56, %v1656_v58 }
  0x8c   : > { %v2104_v48 = vmul.f32 0.70710677, %v2040_v36  ;;  %v538_v23 = vrot.slane %v3225_v52, 1  ;;  %v1902_v35 = vsel %vm762_vm3, %v1899_v34, %v1901_v49  ;;  %v783_v9 = vrot.slane %v678_v57, 2 }
  0x8d   : > { %v784_v51 = vrot.slane %v3234_v53, 2  ;;  %v994_v24 = vmul.f32 %v2660_v19, %v3154_v38  ;;  %v1442_v60 = vadd.f32 %v1342_v17, %v1197_v37  ;;  %v3247_v56 = vmul.f32 %v2660_v19, %v3162_v59 }
  0x8e   : > { %v2394_v21 = vpop.eup %2393  ;;  %2395 = verf.f32 %v2104_v48  ;;  %v539_v28 = vsel %vm516_vm2, %v537_v40, %v538_v23  ;;  %v1239_v26 = vmul.f32 %v2665_v20, %v3154_v38  ;;  %v3259_v43 = vmul.f32 %v2665_v20, %v3162_v59 }
  0x8f   : > { %v2167_v44 = vadd.f32 1.0, %v2394_v21  ;;  %v637_v50 = vadd.f32 %v539_v28, %v359_v10  ;;  %v785_v34 = vsel %vm762_vm3, %v783_v9, %v784_v51  ;;  %v1098_v39 = vrot.slane %v994_v24, 1 }
  0x90   : > { %v1512_v14 = vadd.f32 %v1480_v1, %v1442_v60  ;;  %v1099_v42 = vrot.slane %v3247_v56, 1  ;;  %v921_v61 = vmul.f32 %v2757_v45, %v3154_v38  ;;  %v1554_v55 = vmul.f32 %v2688_v25, %v3242_v13 }
  0x91   : > { %v2199_v11 = vmul.f32 %v2167_v44, %v2071_v12  ;;  %v883_v29 = vadd.f32 %v785_v34, %v637_v50  ;;  %v2072_v0 = vmul.f32 0.5, %v2040_v36  ;;  %v1343_v22 = vrot.slane %v1239_v26, 2  ;;  %v3289_v44 = vld [vmem:[#allocation2 + $0xa0] sm:$0x3] }
  0x92   : > { %v1757_v62 = vadd.f32 %v1657_v16, %v1512_v14  ;;  %v1344_v7 = vrot.slane %v3259_v43, 2  ;;  %v1100_v5 = vsel %vm516_vm2, %v1098_v39, %v1099_v42  ;;  %v1555_v12 = vmul.f32 %v2688_v25, %v3252_v27 }
  0x93   : > { %v2231_v41 = vadd.f32 %v2199_v11, %v4551_v63  ;;  %v953_v31 = vadd.f32 %v921_v61, %v883_v29  ;;  %v1658_v1 = vrot.slane %v1554_v55, 1  ;;  %v1799_v33 = vmul.f32 %v2711_v30, %v3242_v13 }
  0x94   : > { %v2002_v54 = vadd.f32 %v1902_v35, %v1757_v62  ;;  %v1800_v58 = vmul.f32 %v2711_v30, %v3252_v27  ;;  %v1345_v2 = vsel %vm762_vm3, %v1343_v22, %v1344_v7  ;;  %v1659_v36 = vrot.slane %v1555_v12, 1  ;;  %v4552_v62 = vld [vmem:[#allocation6_spill] sm:$0xff] }
  0x95   : > { %2263 = vst.msk [vmem:[%s3091_s17 + $0x28] sm:$0xff] %vm203_vm0, %v2231_v41  ;;  %v1198_v49 = vadd.f32 %v1100_v5, %v953_v31  ;;  %v434_v3 = vmul.f32 %v2590_v4, %v3096_v46  ;;  %v1903_v57 = vrot.slane %v1799_v33, 2  ;;  %v680_v10 = vmul.f32 %v2610_v8, %v3096_v46 }
  0x96   : > { %v2041_v52 = vadd.f32 %v2994_v18, %v2002_v54  ;;  %v1904_v17 = vrot.slane %v1800_v58, 2  ;;  %v1481_v48 = vmul.f32 %v2766_v47, %v3242_v13  ;;  %v360_v37 = vmul.f32 %v2640_v15, %v3035_v32 }
  0x97   : > { %v1443_v40 = vadd.f32 %v1345_v2, %v1198_v49  ;;  %v540_v16 = vrot.slane %v434_v3, 1  ;;  %v1660_v24 = vsel %vm516_vm2, %v1658_v1, %v1659_v36  ;;  %v786_v21 = vrot.slane %v680_v10, 2 }
  0x98   : > { %v2396_v35 = vpop.eup %2395  ;;  %v2105_v9 = vmul.f32 0.70710677, %v2041_v52  ;;  %v922_v60 = vmul.f32 %v2757_v45, %v3162_v59  ;;  %v996_v50 = vmul.f32 %v2660_v19, %v3197_v6  ;;  %v1905_v32 = vsel %vm762_vm3, %v1903_v57, %v1904_v17 }
  0x99   : > { %v2168_v28 = vadd.f32 1.0, %v2396_v35  ;;  %v1513_v56 = vadd.f32 %v1481_v48, %v1443_v40  ;;  %v541_v46 = vsel %vm516_vm2, %v538_v23, %v540_v16  ;;  %v1241_v39 = vmul.f32 %v2665_v20, %v3197_v6 }
  0x9a   : > { %2397 = verf.f32 %v2105_v9  ;;  %v638_v34 = vadd.f32 %v541_v46, %v360_v37  ;;  %v787_v43 = vsel %vm762_vm3, %v784_v51, %v786_v21  ;;  %v1101_v11 = vrot.slane %v996_v50, 1 }
  0x9b   : > { %v2200_v14 = vmul.f32 %v2168_v28, %v2072_v0  ;;  %v1758_v26 = vadd.f32 %v1660_v24, %v1513_v56  ;;  %v1346_v23 = vrot.slane %v1241_v39, 2  ;;  %v1556_v61 = vmul.f32 %v2688_v25, %v3289_v44  ;;  %v3346_v24 = vld [vmem:[#allocation2 + $0xb0] sm:$0xff] }
  0x9c   : > { %v884_v29 = vadd.f32 %v787_v43, %v638_v34  ;;  %v1801_v55 = vmul.f32 %v2711_v30, %v3289_v44  ;;  %v2073_v63 = vmul.f32 0.5, %v2041_v52  ;;  %v1482_v0 = vmul.f32 %v2766_v47, %v3252_v27 }
  0x9d   : > { %v2232_v22 = vadd.f32 %v2200_v14, %v4552_v62  ;;  %v2003_v41 = vadd.f32 %v1905_v32, %v1758_v26  ;;  %v1102_v53 = vsel %vm516_vm2, %v1099_v42, %v1101_v11  ;;  %v1661_v51 = vrot.slane %v1556_v61, 1 }
  0x9e   : > { %v954_v31 = vadd.f32 %v922_v60, %v884_v29  ;;  %v1906_v5 = vrot.slane %v1801_v55, 2  ;;  %v435_v54 = vmul.f32 %v2590_v4, %v3154_v38  ;;  %v3315_v1 = vmul.f32 %v2590_v4, %v3162_v59 }
  0x9f   : > { %2264 = vst.msk [vmem:[%s3091_s17 + $0x30] sm:$0xff] %vm203_vm0, %v2232_v22  ;;  %v2042_v12 = vadd.f32 %v2994_v18, %v2003_v41  ;;  %v681_v33 = vmul.f32 %v2610_v8, %v3154_v38  ;;  %v1347_v49 = vsel %vm762_vm3, %v1344_v7, %v1346_v23  ;;  %v361_v42 = vmul.f32 %v2640_v15, %v3154_v38  ;;  %v4553_v23 = vld [vmem:[#allocation7_spill] sm:$0xff] }
  0xa0   : > { %v1199_v58 = vadd.f32 %v1102_v53, %v954_v31  ;;  %v3324_v2 = vmul.f32 %v2610_v8, %v3162_v59  ;;  %v1662_v52 = vsel %vm516_vm2, %v1659_v36, %v1661_v51  ;;  %v542_v57 = vrot.slane %v435_v54, 1  ;;  %v3339_v36 = vld [vmem:[#allocation2 + $0xa8] sm:$0xff]  ;;  %v3383_v51 = vld [vmem:[%s4469_s1 + $0x1] ss:$0 sm:$0xff] }
  0xa1   : > { %v2106_v3 = vmul.f32 0.70710677, %v2042_v12  ;;  %v543_v4 = vrot.slane %v3315_v1, 1  ;;  %v1907_v40 = vsel %vm762_vm3, %v1904_v17, %v1906_v5  ;;  %v788_v48 = vrot.slane %v681_v33, 2  ;;  %v3390_v5 = vld [vmem:[%s4469_s1 + $0x2] ss:$0 sm:$0xff] }
  0xa2   : > { %v1444_v10 = vadd.f32 %v1347_v49, %v1199_v58  ;;  %v789_v37 = vrot.slane %v3324_v2, 2  ;;  %v997_v8 = vmul.f32 %v2660_v19, %v3242_v13  ;;  %v3337_v38 = vmul.f32 %v2660_v19, %v3252_v27  ;;  %v3399_v49 = vld [vmem:[%s4469_s1] ss:$0 sm:$0xff] }
  0xa3   : > { %2399 = verf.f32 %v2106_v3  ;;  %v544_v15 = vsel %vm516_vm2, %v542_v57, %v543_v4  ;;  %v1242_v9 = vmul.f32 %v2665_v20, %v3242_v13  ;;  %v3351_v19 = vmul.f32 %v2665_v20, %v3252_v27 }
  0xa4   : > { %v2398_v7 = vpop.eup %2397  ;;  %v1514_v16 = vadd.f32 %v1482_v0, %v1444_v10  ;;  %v639_v17 = vadd.f32 %v544_v15, %v361_v42  ;;  %v790_v35 = vsel %vm762_vm3, %v788_v48, %v789_v37  ;;  %v1103_v60 = vrot.slane %v997_v8, 1  ;;  %v3406_v15 = vld [vmem:[#allocation2 + $0xb8] sm:$0x3] }
  0xa5   : > { %v2169_v21 = vadd.f32 1.0, %v2398_v7  ;;  %v1104_v28 = vrot.slane %v3337_v38, 1  ;;  %v923_v50 = vmul.f32 %v2757_v45, %v3242_v13  ;;  %v1348_v32 = vrot.slane %v1242_v9, 2 }
  0xa6   : > { %v1759_v56 = vadd.f32 %v1662_v52, %v1514_v16  ;;  %v885_v46 = vadd.f32 %v790_v35, %v639_v17  ;;  %v2074_v39 = vmul.f32 0.5, %v2042_v12  ;;  %v1349_v14 = vrot.slane %v3351_v19, 2  ;;  %v3424_v17 = vld [vmem:[%s4469_s1 + $0x6] ss:$0 sm:$0xff] }
  0xa7   : > { %v2201_v34 = vmul.f32 %v2169_v21, %v2073_v63  ;;  %v1557_v26 = vmul.f32 %v2688_v25, %v3339_v36  ;;  %v3360_v20 = vmul.f32 %v2688_v25, %v3346_v24  ;;  %v1802_v29 = vmul.f32 %v2711_v30, %v3339_v36 }
  0xa8   : > { %v2004_v43 = vadd.f32 %v1907_v40, %v1759_v56  ;;  %v955_v11 = vadd.f32 %v923_v50, %v885_v46  ;;  %v1105_v55 = vsel %vm516_vm2, %v1103_v60, %v1104_v28  ;;  %v3370_v22 = vmul.f32 %v2711_v30, %v3346_v24  ;;  %v3441_v50 = vld [vmem:[%s4469_s1 + $0xa] ss:$0 sm:$0xff] }
  0xa9   : > { %v2233_v61 = vadd.f32 %v2201_v34, %v4553_v23  ;;  %v1663_v62 = vrot.slane %v1557_v26, 1  ;;  %v1350_v25 = vsel %vm762_vm3, %v1348_v32, %v1349_v14  ;;  %v1664_v0 = vrot.slane %v3360_v20, 1  ;;  %v3449_v26 = vld [vmem:[%s4469_s1 + $0x8] ss:$0 sm:$0xff] }
  0xaa   : > { %v2043_v63 = vadd.f32 %v2994_v18, %v2004_v43  ;;  %v1200_v41 = vadd.f32 %v1105_v55, %v955_v11  ;;  %v1908_v31 = vrot.slane %v1802_v29, 2  ;;  %v1909_v53 = vrot.slane %v3370_v22, 2 }
  0xab   : > { %2265 = vst.msk [vmem:[%s3091_s17 + $0x38] sm:$0xff] %vm203_vm0, %v2233_v61  ;;  %v437_v30 = vmul.f32 %v3383_v51, %v3197_v6  ;;  %v683_v12 = vmul.f32 %v3390_v5, %v3197_v6  ;;  %v1483_v58 = vmul.f32 %v2766_v47, %v3339_v36  ;;  %v362_v42 = vmul.f32 %v3399_v49, %v3162_v59  ;;  %v3411_v47 = vld [vmem:[%s4469_s1 + $0x5] ss:$0 sm:$0xff] }
  0xac   : > { %v2107_v54 = vmul.f32 0.70710677, %v2043_v63  ;;  %v1445_v33 = vadd.f32 %v1350_v25, %v1200_v41  ;;  %v3403_v52 = vmul.f32 0.5, %v2043_v63  ;;  %v1665_v57 = vsel %vm516_vm2, %v1663_v62, %v1664_v0 }
  0xad   : > { %v2400_v3 = vpop.eup %2399  ;;  %v545_v10 = vrot.slane %v437_v30, 1  ;;  %v791_v6 = vrot.slane %v683_v12, 2  ;;  %v999_v59 = vmul.f32 %v3411_v47, %v3289_v44  ;;  %v1910_v8 = vsel %vm762_vm3, %v1908_v31, %v1909_v53 }
  0xae   : > { %v2170_v40 = vadd.f32 1.0, %v2400_v3  ;;  %2401 = verf.f32 %v2107_v54  ;;  %v1515_v48 = vadd.f32 %v1483_v58, %v1445_v33  ;;  %v924_v16 = vmul.f32 %v2757_v45, %v3252_v27  ;;  %v3434_v45 = vld [vmem:[%s4469_s1 + $0x9] ss:$0 sm:$0xff]  ;;  %v3482_v58 = vld [vmem:[#allocation2 + $0xc0] sm:$0xff] }
  0xaf   : > { %v546_v7 = vsel %vm516_vm2, %v543_v4, %v545_v10  ;;  %v1244_v35 = vmul.f32 %v3424_v17, %v3289_v44  ;;  %v792_v1 = vsel %vm762_vm3, %v789_v37, %v791_v6  ;;  %v1106_v4 = vrot.slane %v999_v59, 1  ;;  %v4554_v37 = vld [vmem:[#allocation8_spill] sm:$0xff] }
  0xb0   : > { %v2202_v9 = vmul.f32 %v2170_v40, %v2074_v39  ;;  %v1760_v21 = vadd.f32 %v1665_v57, %v1515_v48  ;;  %v640_v60 = vadd.f32 %v546_v7, %v362_v42  ;;  %v1559_v46 = vmul.f32 %v3434_v45, %v3406_v15  ;;  %v3492_v40 = vld [vmem:[#allocation2 + $0xc8] sm:$0xff] }
  0xb1   : > { %v1351_v56 = vrot.slane %v1244_v35, 2  ;;  %v1804_v2 = vmul.f32 %v3441_v50, %v3406_v15  ;;  %v1484_v43 = vmul.f32 %v3449_v26, %v3346_v24  ;;  %v363_v29 = vmul.f32 %v3399_v49, %v3242_v13 }
  0xb2   : > { %v2234_v32 = vadd.f32 %v2202_v9, %v4554_v37  ;;  %v2005_v34 = vadd.f32 %v1910_v8, %v1760_v21  ;;  %v886_v39 = vadd.f32 %v792_v1, %v640_v60  ;;  %v1666_v11 = vrot.slane %v1559_v46, 1  ;;  %v3505_v9 = vld [vmem:[%s4469_s1 + $0x4] ss:$0 sm:$0xff] }
  0xb3   : > { %v1911_v20 = vrot.slane %v1804_v2, 2  ;;  %v438_v23 = vmul.f32 %v3383_v51, %v3242_v13  ;;  %v3462_v62 = vmul.f32 %v3383_v51, %v3252_v27  ;;  %v684_v22 = vmul.f32 %v3390_v5, %v3242_v13  ;;  %v4555_v2 = vld [vmem:[#allocation9_spill] sm:$0xff] }
  0xb4   : > { %2266 = vst.msk [vmem:[%s3091_s17 + $0x40] sm:$0xff] %vm203_vm0, %v2234_v32  ;;  %v2044_v61 = vadd.f32 %v2994_v18, %v2005_v34  ;;  %v956_v55 = vadd.f32 %v924_v16, %v886_v39  ;;  %v1107_v63 = vsel %vm516_vm2, %v1104_v28, %v1106_v4  ;;  %v1352_v41 = vsel %vm762_vm3, %v1349_v14, %v1351_v56 }
  0xb5   : > { %v547_v25 = vrot.slane %v438_v23, 1  ;;  %v3474_v31 = vmul.f32 %v3390_v5, %v3252_v27  ;;  %v1667_v54 = vsel %vm516_vm2, %v1664_v0, %v1666_v11  ;;  %v548_v33 = vrot.slane %v3462_v62, 1 }
  0xb6   : > { %v2108_v30 = vmul.f32 0.70710677, %v2044_v61  ;;  %v1201_v12 = vadd.f32 %v1107_v63, %v956_v55  ;;  %v1912_v13 = vsel %vm762_vm3, %v1909_v53, %v1911_v20  ;;  %v793_v38 = vrot.slane %v684_v22, 2 }
  0xb7   : > { %v794_v28 = vrot.slane %v3474_v31, 2  ;;  %v1000_v19 = vmul.f32 %v3411_v47, %v3339_v36  ;;  %v549_v3 = vsel %vm516_vm2, %v547_v25, %v548_v33  ;;  %v3487_v0 = vmul.f32 %v3411_v47, %v3346_v24 }
  0xb8   : > { %v2402_v14 = vpop.eup %2401  ;;  %2403 = verf.f32 %v2108_v30  ;;  %v1446_v42 = vadd.f32 %v1352_v41, %v1201_v12  ;;  %v641_v10 = vadd.f32 %v549_v3, %v363_v29  ;;  %v1245_v8 = vmul.f32 %v3424_v17, %v3339_v36 }
  0xb9   : > { %v2171_v57 = vadd.f32 1.0, %v2402_v14  ;;  %v795_v53 = vsel %vm762_vm3, %v793_v38, %v794_v28  ;;  %v1108_v6 = vrot.slane %v1000_v19, 1  ;;  %v1109_v59 = vrot.slane %v3487_v0, 1 }
  0xba   : > { %v1516_v48 = vadd.f32 %v1484_v43, %v1446_v42  ;;  %v3499_v7 = vmul.f32 %v3424_v17, %v3346_v24  ;;  %v887_v35 = vadd.f32 %v795_v53, %v641_v10  ;;  %v925_v21 = vmul.f32 %v3505_v9, %v3339_v36 }
  0xbb   : > { %v2203_v16 = vmul.f32 %v2171_v57, %v3403_v52  ;;  %v1560_v60 = vmul.f32 %v3434_v45, %v3482_v58  ;;  %v2076_v1 = vmul.f32 0.5, %v2044_v61  ;;  %v1353_v56 = vrot.slane %v1245_v8, 2  ;;  %v3535_v57 = vld [vmem:[#allocation2 + $0xd0] sm:$0x3] }
  0xbc   : > { %v1761_v4 = vadd.f32 %v1667_v54, %v1516_v48  ;;  %v1354_v46 = vrot.slane %v3499_v7, 2  ;;  %v957_v37 = vadd.f32 %v925_v21, %v887_v35  ;;  %v1110_v32 = vsel %vm516_vm2, %v1108_v6, %v1109_v59 }
  0xbd   : > { %v2235_v52 = vadd.f32 %v2203_v16, %v4555_v2  ;;  %v1561_v34 = vmul.f32 %v3434_v45, %v3492_v40  ;;  %v1668_v43 = vrot.slane %v1560_v60, 1  ;;  %v1805_v11 = vmul.f32 %v3441_v50, %v3482_v58 }
  0xbe   : > { %v2006_v39 = vadd.f32 %v1912_v13, %v1761_v4  ;;  %v1806_v20 = vmul.f32 %v3441_v50, %v3492_v40  ;;  %v1202_v29 = vadd.f32 %v1110_v32, %v957_v37  ;;  %v1355_v23 = vsel %vm762_vm3, %v1353_v56, %v1354_v46  ;;  %v4556_v4 = vld [vmem:[#allocation10_spill] sm:$0xff] }
  0xbf   : > { %2267 = vst.msk [vmem:[%s3091_s17 + $0x48] sm:$0xff] %vm203_vm0, %v2235_v52  ;;  %v1669_v61 = vrot.slane %v1561_v34, 1  ;;  %v440_v55 = vmul.f32 %v3383_v51, %v3289_v44  ;;  %v1913_v22 = vrot.slane %v1805_v11, 2  ;;  %v686_v41 = vmul.f32 %v3390_v5, %v3289_v44 }
  0xc0   : > { %v2045_v62 = vadd.f32 %v2994_v18, %v2006_v39  ;;  %v1914_v63 = vrot.slane %v1806_v20, 2  ;;  %v1447_v25 = vadd.f32 %v1355_v23, %v1202_v29  ;;  %v1485_v30 = vmul.f32 %v3449_v26, %v3482_v58 }
  0xc1   : > { %v364_v12 = vmul.f32 %v3399_v49, %v3252_v27  ;;  %v550_v54 = vrot.slane %v440_v55, 1  ;;  %v1670_v19 = vsel %vm516_vm2, %v1668_v43, %v1669_v61  ;;  %v796_v14 = vrot.slane %v686_v41, 2 }
  0xc2   : > { %v2404_v13 = vpop.eup %2403  ;;  %v2109_v38 = vmul.f32 0.70710677, %v2045_v62  ;;  %v926_v42 = vmul.f32 %v3505_v9, %v3346_v24  ;;  %v1517_v0 = vadd.f32 %v1485_v30, %v1447_v25  ;;  %v1002_v10 = vmul.f32 %v3411_v47, %v3406_v15 }
  0xc3   : > { %v2172_v3 = vadd.f32 1.0, %v2404_v13  ;;  %v551_v44 = vsel %vm516_vm2, %v548_v33, %v550_v54  ;;  %v1915_v27 = vsel %vm762_vm3, %v1913_v22, %v1914_v63  ;;  %v1247_v6 = vmul.f32 %v3424_v17, %v3406_v15  ;;  %v3583_v13 = vld [vmem:[#allocation2 + $0xd8] sm:$0xff] }
  0xc4   : > { %2405 = verf.f32 %v2109_v38  ;;  %v642_v53 = vadd.f32 %v551_v44, %v364_v12  ;;  %v1762_v8 = vadd.f32 %v1670_v19, %v1517_v0  ;;  %v797_v7 = vsel %vm762_vm3, %v794_v28, %v796_v14 }
  0xc5   : > { %v2204_v48 = vmul.f32 %v2172_v3, %v2076_v1  ;;  %v1111_v16 = vrot.slane %v1002_v10, 1  ;;  %v1356_v33 = vrot.slane %v1247_v6, 2  ;;  %v1562_v21 = vmul.f32 %v3434_v45, %v3535_v57 }
  0xc6   : > { %v888_v35 = vadd.f32 %v797_v7, %v642_v53  ;;  %v1807_v60 = vmul.f32 %v3441_v50, %v3535_v57  ;;  %v2077_v2 = vmul.f32 0.5, %v2045_v62  ;;  %v2007_v52 = vadd.f32 %v1915_v27, %v1762_v8 }
  0xc7   : > { %v2236_v56 = vadd.f32 %v2204_v48, %v4556_v4  ;;  %v1486_v1 = vmul.f32 %v3449_v26, %v3492_v40  ;;  %v1112_v31 = vsel %vm516_vm2, %v1109_v59, %v1111_v16  ;;  %v1671_v28 = vrot.slane %v1562_v21, 1 }
  0xc8   : > { %v958_v37 = vadd.f32 %v926_v42, %v888_v35  ;;  %v1916_v32 = vrot.slane %v1807_v60, 2  ;;  %v2046_v34 = vadd.f32 %v2994_v18, %v2007_v52  ;;  %v441_v39 = vmul.f32 %v3383_v51, %v3339_v36  ;;  %v3590_v42 = vld [vmem:[#allocation2 + $0xe0] sm:$0xff] }
  0xc9   : > { %2268 = vst.msk [vmem:[%s3091_s17 + $0x50] sm:$0xff] %vm203_vm0, %v2236_v56  ;;  %v3561_v43 = vmul.f32 %v3383_v51, %v3346_v24  ;;  %v687_v11 = vmul.f32 %v3390_v5, %v3339_v36  ;;  %v1357_v29 = vsel %vm762_vm3, %v1354_v46, %v1356_v33  ;;  %v365_v59 = vmul.f32 %v3399_v49, %v3339_v36  ;;  %v4557_v56 = vld [vmem:[#allocation11_spill] sm:$0xff] }
  0xca   : > { %v1203_v20 = vadd.f32 %v1112_v31, %v958_v37  ;;  %v3570_v23 = vmul.f32 %v3390_v5, %v3346_v24  ;;  %v2110_v18 = vmul.f32 0.70710677, %v2046_v34  ;;  %v1672_v55 = vsel %vm516_vm2, %v1669_v61, %v1671_v28  ;;  %v3617_v31 = vld [vmem:[%s4470_s2] ss:$0 sm:$0xff] }
  0xcb   : > { %v552_v62 = vrot.slane %v441_v39, 1  ;;  %v553_v22 = vrot.slane %v3561_v43, 1  ;;  %v1917_v25 = vsel %vm762_vm3, %v1914_v63, %v1916_v32  ;;  %v798_v30 = vrot.slane %v687_v11, 2 }
  0xcc   : > { %v1448_v41 = vadd.f32 %v1357_v29, %v1203_v20  ;;  %v799_v12 = vrot.slane %v3570_v23, 2  ;;  %2407 = verf.f32 %v2110_v18  ;;  %v1003_v36 = vmul.f32 %v3411_v47, %v3482_v58 }
  0xcd   : > { %v554_v46 = vsel %vm516_vm2, %v552_v62, %v553_v22  ;;  %v3581_v54 = vmul.f32 %v3411_v47, %v3492_v40  ;;  %v1248_v14 = vmul.f32 %v3424_v17, %v3482_v58  ;;  %v3595_v10 = vmul.f32 %v3424_v17, %v3492_v40 }
  0xce   : > { %v2406_v61 = vpop.eup %2405  ;;  %v1518_v38 = vadd.f32 %v1486_v1, %v1448_v41  ;;  %v643_v19 = vadd.f32 %v554_v46, %v365_v59  ;;  %v800_v63 = vsel %vm762_vm3, %v798_v30, %v799_v12  ;;  %v1113_v0 = vrot.slane %v1003_v36, 1 }
  0xcf   : > { %v2173_v3 = vadd.f32 1.0, %v2406_v61  ;;  %v1114_v44 = vrot.slane %v3581_v54, 1  ;;  %v927_v6 = vmul.f32 %v3505_v9, %v3482_v58  ;;  %v1358_v48 = vrot.slane %v1248_v14, 2 }
  0xd0   : > { %v1763_v27 = vadd.f32 %v1672_v55, %v1518_v38  ;;  %v889_v53 = vadd.f32 %v800_v63, %v643_v19  ;;  %v2078_v7 = vmul.f32 0.5, %v2046_v34  ;;  %v1359_v16 = vrot.slane %v3595_v10, 2  ;;  %v3633_v19 = vld [vmem:[#allocation2 + $0xe8] sm:$0x3] }
  0xd1   : > { %v2205_v8 = vmul.f32 %v2173_v3, %v2077_v2  ;;  %v1563_v35 = vmul.f32 %v3434_v45, %v3583_v13  ;;  %v3604_v60 = vmul.f32 %v3434_v45, %v3590_v42  ;;  %v1808_v4 = vmul.f32 %v3441_v50, %v3583_v13 }
  0xd2   : > { %v2008_v33 = vadd.f32 %v1917_v25, %v1763_v27  ;;  %v959_v21 = vadd.f32 %v927_v6, %v889_v53  ;;  %v1115_v2 = vsel %vm516_vm2, %v1113_v0, %v1114_v44  ;;  %v1809_v37 = vmul.f32 %v3441_v50, %v3590_v42 }
  0xd3   : > { %v2237_v52 = vadd.f32 %v2205_v8, %v4557_v56  ;;  %v1673_v1 = vrot.slane %v1563_v35, 1  ;;  %v1360_v34 = vsel %vm762_vm3, %v1358_v48, %v1359_v16  ;;  %v1674_v39 = vrot.slane %v3604_v60, 1  ;;  %v4558_v35 = vld [vmem:[#allocation12_spill] sm:$0xff] }
  0xd4   : > { %v2047_v28 = vadd.f32 %v3617_v31, %v2008_v33  ;;  %v1204_v32 = vadd.f32 %v1115_v2, %v959_v21  ;;  %v1918_v43 = vrot.slane %v1808_v4, 2  ;;  %v1919_v11 = vrot.slane %v1809_v37, 2 }
  0xd5   : > { %2269 = vst.msk [vmem:[%s3091_s17 + $0x58] sm:$0xff] %vm203_vm0, %v2237_v52  ;;  %v443_v20 = vmul.f32 %v3383_v51, %v3406_v15  ;;  %v689_v29 = vmul.f32 %v3390_v5, %v3406_v15  ;;  %v1487_v55 = vmul.f32 %v3449_v26, %v3583_v13  ;;  %v366_v62 = vmul.f32 %v3399_v49, %v3346_v24 }
  0xd6   : > { %v2111_v59 = vmul.f32 0.70710677, %v2047_v28  ;;  %v1449_v18 = vadd.f32 %v1360_v34, %v1204_v32  ;;  %v2408_v41 = vpop.eup %2407  ;;  %v2079_v25 = vmul.f32 0.5, %v2047_v28  ;;  %v1675_v30 = vsel %vm516_vm2, %v1673_v1, %v1674_v39 }
  0xd7   : > { %v555_v46 = vrot.slane %v443_v20, 1  ;;  %v801_v36 = vrot.slane %v689_v29, 2  ;;  %v2174_v61 = vadd.f32 1.0, %v2408_v41  ;;  %v1005_v15 = vmul.f32 %v3411_v47, %v3535_v57 }
  0xd8   : > { %2409 = verf.f32 %v2111_v59  ;;  %v1519_v38 = vadd.f32 %v1487_v55, %v1449_v18  ;;  %v1920_v63 = vsel %vm762_vm3, %v1918_v43, %v1919_v11  ;;  %v928_v24 = vmul.f32 %v3505_v9, %v3492_v40 }
  0xd9   : > { %v556_v14 = vsel %vm516_vm2, %v553_v22, %v555_v46  ;;  %v1250_v3 = vmul.f32 %v3424_v17, %v3535_v57  ;;  %v2206_v0 = vmul.f32 %v2174_v61, %v2078_v7  ;;  %v802_v53 = vsel %vm762_vm3, %v799_v12, %v801_v36 }
  0xda   : > { %v1764_v10 = vadd.f32 %v1675_v30, %v1519_v38  ;;  %v644_v27 = vadd.f32 %v556_v14, %v366_v62  ;;  %v1116_v6 = vrot.slane %v1005_v15, 1  ;;  %v1565_v8 = vmul.f32 %v3434_v45, %v3633_v19  ;;  %v3680_v62 = vld [vmem:[#allocation2 + $0xf0] sm:$0xff]  ;;  %v3690_v38 = vld [vmem:[#allocation2 + $0xf8] sm:$0xff] }
  0xdb   : > { %v1361_v48 = vrot.slane %v1250_v3, 2  ;;  %v1810_v22 = vmul.f32 %v3441_v50, %v3633_v19  ;;  %v2238_v33 = vadd.f32 %v2206_v0, %v4558_v35  ;;  %v1488_v7 = vmul.f32 %v3449_v26, %v3590_v42 }
  0xdc   : > { %v2009_v21 = vadd.f32 %v1920_v63, %v1764_v10  ;;  %v890_v60 = vadd.f32 %v802_v53, %v644_v27  ;;  %v1676_v4 = vrot.slane %v1565_v8, 1  ;;  %v367_v23 = vmul.f32 %v3399_v49, %v3482_v58 }
  0xdd   : > { %v1921_v56 = vrot.slane %v1810_v22, 2  ;;  %v444_v12 = vmul.f32 %v3383_v51, %v3482_v58  ;;  %2270 = vst.msk [vmem:[%s3091_s17 + $0x60] sm:$0xff] %vm203_vm0, %v2238_v33  ;;  %v3662_v1 = vmul.f32 %v3383_v51, %v3492_v40  ;;  %v690_v37 = vmul.f32 %v3390_v5, %v3482_v58  ;;  %v4559_v22 = vld [vmem:[#allocation13_spill] sm:$0xff] }
  0xde   : > { %v2048_v52 = vadd.f32 %v3617_v31, %v2009_v21  ;;  %v960_v2 = vadd.f32 %v928_v24, %v890_v60  ;;  %v1117_v28 = vsel %vm516_vm2, %v1114_v44, %v1116_v6  ;;  %v1362_v32 = vsel %vm762_vm3, %v1359_v16, %v1361_v48 }
  0xdf   : > { %v557_v34 = vrot.slane %v444_v12, 1  ;;  %v3672_v43 = vmul.f32 %v3390_v5, %v3492_v40  ;;  %v1677_v59 = vsel %vm516_vm2, %v1674_v39, %v1676_v4  ;;  %v558_v18 = vrot.slane %v3662_v1, 1 }
  0xe0   : > { %v2112_v20 = vmul.f32 0.70710677, %v2048_v52  ;;  %v1205_v29 = vadd.f32 %v1117_v28, %v960_v2  ;;  %v1922_v55 = vsel %vm762_vm3, %v1919_v11, %v1921_v56  ;;  %v803_v58 = vrot.slane %v690_v37, 2 }
  0xe1   : > { %v804_v54 = vrot.slane %v3672_v43, 2  ;;  %v1006_v44 = vmul.f32 %v3411_v47, %v3583_v13  ;;  %v559_v30 = vsel %vm516_vm2, %v557_v34, %v558_v18  ;;  %v3685_v39 = vmul.f32 %v3411_v47, %v3590_v42 }
  0xe2   : > { %v2410_v16 = vpop.eup %2409  ;;  %2411 = verf.f32 %v2112_v20  ;;  %v1450_v41 = vadd.f32 %v1362_v32, %v1205_v29  ;;  %v645_v36 = vadd.f32 %v559_v30, %v367_v23  ;;  %v1251_v14 = vmul.f32 %v3424_v17, %v3583_v13 }
  0xe3   : > { %v2175_v46 = vadd.f32 1.0, %v2410_v16  ;;  %v805_v11 = vsel %vm762_vm3, %v803_v58, %v804_v54  ;;  %v1118_v61 = vrot.slane %v1006_v44, 1  ;;  %v1119_v63 = vrot.slane %v3685_v39, 1 }
  0xe4   : > { %v1520_v15 = vadd.f32 %v1488_v7, %v1450_v41  ;;  %v3697_v24 = vmul.f32 %v3424_v17, %v3590_v42  ;;  %v891_v0 = vadd.f32 %v805_v11, %v645_v36  ;;  %v929_v10 = vmul.f32 %v3505_v9, %v3583_v13 }
  0xe5   : > { %v2207_v3 = vmul.f32 %v2175_v46, %v2079_v25  ;;  %v1566_v27 = vmul.f32 %v3434_v45, %v3680_v62  ;;  %v2080_v53 = vmul.f32 0.5, %v2048_v52  ;;  %v1363_v48 = vrot.slane %v1251_v14, 2  ;;  %v3727_v46 = vld [vmem:[#allocation2 + $0x100] sm:$0x3] }
  0xe6   : > { %v1765_v6 = vadd.f32 %v1677_v59, %v1520_v15  ;;  %v1364_v8 = vrot.slane %v3697_v24, 2  ;;  %v961_v33 = vadd.f32 %v929_v10, %v891_v0  ;;  %v1120_v21 = vsel %vm516_vm2, %v1118_v61, %v1119_v63 }
  0xe7   : > { %v2239_v35 = vadd.f32 %v2207_v3, %v4559_v22  ;;  %v1567_v25 = vmul.f32 %v3434_v45, %v3690_v38  ;;  %v1678_v7 = vrot.slane %v1566_v27, 1  ;;  %v1811_v4 = vmul.f32 %v3441_v50, %v3680_v62 }
  0xe8   : > { %v2010_v60 = vadd.f32 %v1922_v55, %v1765_v6  ;;  %v1812_v56 = vmul.f32 %v3441_v50, %v3690_v38  ;;  %v1206_v23 = vadd.f32 %v1120_v21, %v961_v33  ;;  %v1365_v12 = vsel %vm762_vm3, %v1363_v48, %v1364_v8  ;;  %v4560_v6 = vld [vmem:[#allocation14_spill] sm:$0xff] }
  0xe9   : > { %2271 = vst.msk [vmem:[%s3091_s17 + $0x68] sm:$0xff] %vm203_vm0, %v2239_v35  ;;  %v1679_v52 = vrot.slane %v1567_v25, 1  ;;  %v446_v2 = vmul.f32 %v3383_v51, %v3535_v57  ;;  %v1923_v37 = vrot.slane %v1811_v4, 2  ;;  %v692_v32 = vmul.f32 %v3390_v5, %v3535_v57 }
  0xea   : > { %v2049_v1 = vadd.f32 %v3617_v31, %v2010_v60  ;;  %v1924_v28 = vrot.slane %v1812_v56, 2  ;;  %v1451_v34 = vadd.f32 %v1365_v12, %v1206_v23  ;;  %v1489_v20 = vmul.f32 %v3449_v26, %v3680_v62 }
  0xeb   : > { %v368_v29 = vmul.f32 %v3399_v49, %v3492_v40  ;;  %v560_v59 = vrot.slane %v446_v2, 1  ;;  %v1680_v44 = vsel %vm516_vm2, %v1678_v7, %v1679_v52  ;;  %v806_v16 = vrot.slane %v692_v32, 2 }
  0xec   : > { %v2412_v55 = vpop.eup %2411  ;;  %v2113_v58 = vmul.f32 0.70710677, %v2049_v1  ;;  %v930_v41 = vmul.f32 %v3505_v9, %v3590_v42  ;;  %v1521_v39 = vadd.f32 %v1489_v20, %v1451_v34  ;;  %v1008_v36 = vmul.f32 %v3411_v47, %v3633_v19 }
  0xed   : > { %v2176_v30 = vadd.f32 1.0, %v2412_v55  ;;  %v561_v57 = vsel %vm516_vm2, %v558_v18, %v560_v59  ;;  %v1925_v40 = vsel %vm762_vm3, %v1923_v37, %v1924_v28  ;;  %v1253_v61 = vmul.f32 %v3424_v17, %v3633_v19 }
  0xee   : > { %2413 = verf.f32 %v2113_v58  ;;  %v646_v11 = vadd.f32 %v561_v57, %v368_v29  ;;  %v1766_v14 = vadd.f32 %v1680_v44, %v1521_v39  ;;  %v807_v24 = vsel %vm762_vm3, %v804_v54, %v806_v16  ;;  %v3775_v58 = vld [vmem:[#allocation2 + $0x108] sm:$0xff] }
  0xef   : > { %v2208_v15 = vmul.f32 %v2176_v30, %v2080_v53  ;;  %v1121_v3 = vrot.slane %v1008_v36, 1  ;;  %v1366_v18 = vrot.slane %v1253_v61, 2  ;;  %v1568_v10 = vmul.f32 %v3434_v45, %v3727_v46  ;;  %v3782_v30 = vld [vmem:[#allocation2 + $0x110] sm:$0xff] }
  0xf0   : > { %v892_v0 = vadd.f32 %v807_v24, %v646_v11  ;;  %v1813_v27 = vmul.f32 %v3441_v50, %v3727_v46  ;;  %v2081_v22 = vmul.f32 0.5, %v2049_v1  ;;  %v2011_v35 = vadd.f32 %v1925_v40, %v1766_v14 }
  0xf1   : > { %v2240_v48 = vadd.f32 %v2208_v15, %v4560_v6  ;;  %v1490_v53 = vmul.f32 %v3449_v26, %v3690_v38  ;;  %v1122_v43 = vsel %vm516_vm2, %v1119_v63, %v1121_v3  ;;  %v1681_v54 = vrot.slane %v1568_v10, 1 }
  0xf2   : > { %v962_v33 = vadd.f32 %v930_v41, %v892_v0  ;;  %v1926_v21 = vrot.slane %v1813_v27, 2  ;;  %v2050_v25 = vadd.f32 %v3617_v31, %v2011_v35  ;;  %v447_v60 = vmul.f32 %v3383_v51, %v3583_v13  ;;  %v4561_v35 = vld [vmem:[#allocation15_spill] sm:$0xff] }
  0xf3   : > { %2272 = vst.msk [vmem:[%s3091_s17 + $0x70] sm:$0xff] %vm203_vm0, %v2240_v48  ;;  %v3753_v7 = vmul.f32 %v3383_v51, %v3590_v42  ;;  %v693_v4 = vmul.f32 %v3390_v5, %v3583_v13  ;;  %v1367_v23 = vsel %vm762_vm3, %v1364_v8, %v1366_v18  ;;  %v369_v63 = vmul.f32 %v3399_v49, %v3583_v13 }
  0xf4   : > { %v1207_v56 = vadd.f32 %v1122_v43, %v962_v33  ;;  %v3762_v12 = vmul.f32 %v3390_v5, %v3590_v42  ;;  %v2114_v2 = vmul.f32 0.70710677, %v2050_v25  ;;  %v1682_v1 = vsel %vm516_vm2, %v1679_v52, %v1681_v54 }
  0xf5   : > { %v562_v37 = vrot.slane %v447_v60, 1  ;;  %v563_v32 = vrot.slane %v3753_v7, 1  ;;  %v1927_v20 = vsel %vm762_vm3, %v1924_v28, %v1926_v21  ;;  %v808_v29 = vrot.slane %v693_v4, 2 }
  0xf6   : > { %v1452_v34 = vadd.f32 %v1367_v23, %v1207_v56  ;;  %v809_v59 = vrot.slane %v3762_v12, 2  ;;  %2415 = verf.f32 %v2114_v2  ;;  %v1009_v13 = vmul.f32 %v3411_v47, %v3680_v62 }
  0xf7   : > { %v564_v8 = vsel %vm516_vm2, %v562_v37, %v563_v32  ;;  %v3773_v55 = vmul.f32 %v3411_v47, %v3690_v38  ;;  %v1254_v41 = vmul.f32 %v3424_v17, %v3680_v62  ;;  %v3787_v40 = vmul.f32 %v3424_v17, %v3690_v38 }
  0xf8   : > { %v2414_v52 = vpop.eup %2413  ;;  %v1522_v44 = vadd.f32 %v1490_v53, %v1452_v34  ;;  %v647_v16 = vadd.f32 %v564_v8, %v369_v63  ;;  %v810_v28 = vsel %vm762_vm3, %v808_v29, %v809_v59  ;;  %v1123_v57 = vrot.slane %v1009_v13, 1 }
  0xf9   : > { %v2177_v39 = vadd.f32 1.0, %v2414_v52  ;;  %v1124_v36 = vrot.slane %v3773_v55, 1  ;;  %v931_v15 = vmul.f32 %v3505_v9, %v3680_v62  ;;  %v1368_v14 = vrot.slane %v1254_v41, 2 }
  0xfa   : > { %v1767_v11 = vadd.f32 %v1682_v1, %v1522_v44  ;;  %v893_v61 = vadd.f32 %v810_v28, %v647_v16  ;;  %v2082_v3 = vmul.f32 0.5, %v2050_v25  ;;  %v1369_v0 = vrot.slane %v3787_v40, 2  ;;  %v3817_v16 = vld [vmem:[#allocation2 + $0x118] sm:$0x3] }
  0xfb   : > { %v2209_v24 = vmul.f32 %v2177_v39, %v2081_v22  ;;  %v1569_v18 = vmul.f32 %v3434_v45, %v3775_v58  ;;  %v1570_v6 = vmul.f32 %v3434_v45, %v3782_v30  ;;  %v1814_v48 = vmul.f32 %v3441_v50, %v3775_v58 }
  0xfc   : > { %v2012_v10 = vadd.f32 %v1927_v20, %v1767_v11  ;;  %v963_v27 = vadd.f32 %v931_v15, %v893_v61  ;;  %v1125_v22 = vsel %vm516_vm2, %v1123_v57, %v1124_v36  ;;  %v1815_v43 = vmul.f32 %v3441_v50, %v3782_v30 }
  0xfd   : > { %v2241_v53 = vadd.f32 %v2209_v24, %v4561_v35  ;;  %v1683_v33 = vrot.slane %v1569_v18, 1  ;;  %v1370_v25 = vsel %vm762_vm3, %v1368_v14, %v1369_v0  ;;  %v1684_v60 = vrot.slane %v1570_v6, 1  ;;  %v4562_v18 = vld [vmem:[#allocation16_spill] sm:$0xff] }
  0xfe   : > { %v2051_v54 = vadd.f32 %v3617_v31, %v2012_v10  ;;  %v1208_v21 = vadd.f32 %v1125_v22, %v963_v27  ;;  %v1928_v7 = vrot.slane %v1814_v48, 2  ;;  %v1929_v4 = vrot.slane %v1815_v43, 2 }
  0xff   : > { %2273 = vst.msk [vmem:[%s3091_s17 + $0x78] sm:$0xff] %vm203_vm0, %v2241_v53  ;;  %v449_v56 = vmul.f32 %v3383_v51, %v3633_v19  ;;  %v695_v23 = vmul.f32 %v3390_v5, %v3633_v19  ;;  %v1491_v1 = vmul.f32 %v3449_v26, %v3775_v58  ;;  %v370_v37 = vmul.f32 %v3399_v49, %v3590_v42 }
 0x100   : > { %v2115_v63 = vmul.f32 0.70710677, %v2051_v54  ;;  %v1453_v2 = vadd.f32 %v1370_v25, %v1208_v21  ;;  %v2416_v34 = vpop.eup %2415  ;;  %v2083_v20 = vmul.f32 0.5, %v2051_v54  ;;  %v1685_v29 = vsel %vm516_vm2, %v1683_v33, %v1684_v60 }
 0x101   : > { %v565_v8 = vrot.slane %v449_v56, 1  ;;  %v811_v13 = vrot.slane %v695_v23, 2  ;;  %v2178_v52 = vadd.f32 1.0, %v2416_v34  ;;  %v1011_v19 = vmul.f32 %v3411_v47, %v3727_v46 }
 0x102   : > { %2417 = verf.f32 %v2115_v63  ;;  %v1523_v44 = vadd.f32 %v1491_v1, %v1453_v2  ;;  %v1930_v28 = vsel %vm762_vm3, %v1928_v7, %v1929_v4  ;;  %v932_v42 = vmul.f32 %v3505_v9, %v3690_v38 }
 0x103   : > { %v566_v41 = vsel %vm516_vm2, %v563_v32, %v565_v8  ;;  %v1256_v39 = vmul.f32 %v3424_v17, %v3727_v46  ;;  %v2210_v57 = vmul.f32 %v2178_v52, %v2082_v3  ;;  %v812_v61 = vsel %vm762_vm3, %v809_v59, %v811_v13 }
 0x104   : > { %v1768_v40 = vadd.f32 %v1685_v29, %v1523_v44  ;;  %v648_v11 = vadd.f32 %v566_v41, %v370_v37  ;;  %v1126_v15 = vrot.slane %v1011_v19, 1  ;;  %v1571_v24 = vmul.f32 %v3434_v45, %v3817_v16  ;;  %v3864_v37 = vld [vmem:[#allocation2 + $0x120] sm:$0xff]  ;;  %v3874_v44 = vld [vmem:[#allocation2 + $0x128] sm:$0xff] }
 0x105   : > { %v1371_v14 = vrot.slane %v1256_v39, 2  ;;  %v1816_v32 = vmul.f32 %v3441_v50, %v3817_v16  ;;  %v2242_v10 = vadd.f32 %v2210_v57, %v4562_v18  ;;  %v1492_v3 = vmul.f32 %v3449_v26, %v3782_v30 }
 0x106   : > { %v2013_v27 = vadd.f32 %v1930_v28, %v1768_v40  ;;  %v894_v6 = vadd.f32 %v812_v61, %v648_v11  ;;  %v1686_v48 = vrot.slane %v1571_v24, 1  ;;  %v371_v12 = vmul.f32 %v3399_v49, %v3680_v62 }
 0x107   : > { %v1931_v35 = vrot.slane %v1816_v32, 2  ;;  %v450_v59 = vmul.f32 %v3383_v51, %v3680_v62  ;;  %2274 = vst.msk [vmem:[%s3091_s17 + $0x80] sm:$0xff] %vm203_vm0, %v2242_v10  ;;  %v3846_v33 = vmul.f32 %v3383_v51, %v3690_v38  ;;  %v696_v43 = vmul.f32 %v3390_v5, %v3680_v62  ;;  %v4563_v32 = vld [vmem:[#allocation17_spill] sm:$0xff] }
 0x108   : > { %v2052_v53 = vadd.f32 %v3617_v31, %v2013_v27  ;;  %v964_v22 = vadd.f32 %v932_v42, %v894_v6  ;;  %v1127_v54 = vsel %vm516_vm2, %v1124_v36, %v1126_v15  ;;  %v1372_v21 = vsel %vm762_vm3, %v1369_v0, %v1371_v14 }
 0x109   : > { %v567_v25 = vrot.slane %v450_v59, 1  ;;  %v3856_v7 = vmul.f32 %v3390_v5, %v3690_v38  ;;  %v1687_v63 = vsel %vm516_vm2, %v1684_v60, %v1686_v48  ;;  %v568_v2 = vrot.slane %v3846_v33, 1 }
 0x10a   : > { %v2116_v56 = vmul.f32 0.70710677, %v2052_v53  ;;  %v1209_v23 = vadd.f32 %v1127_v54, %v964_v22  ;;  %v1932_v1 = vsel %vm762_vm3, %v1929_v4, %v1931_v35  ;;  %v813_v62 = vrot.slane %v696_v43, 2 }
 0x10b   : > { %v814_v55 = vrot.slane %v3856_v7, 2  ;;  %v1012_v36 = vmul.f32 %v3411_v47, %v3775_v58  ;;  %v569_v29 = vsel %vm516_vm2, %v567_v25, %v568_v2  ;;  %v3869_v60 = vmul.f32 %v3411_v47, %v3782_v30 }
 0x10c   : > { %v2418_v0 = vpop.eup %2417  ;;  %2419 = verf.f32 %v2116_v56  ;;  %v1454_v34 = vadd.f32 %v1372_v21, %v1209_v23  ;;  %v649_v13 = vadd.f32 %v569_v29, %v371_v12  ;;  %v1257_v41 = vmul.f32 %v3424_v17, %v3775_v58 }
 0x10d   : > { %v2179_v8 = vadd.f32 1.0, %v2418_v0  ;;  %v815_v4 = vsel %vm762_vm3, %v813_v62, %v814_v55  ;;  %v1128_v52 = vrot.slane %v1012_v36, 1  ;;  %v1129_v28 = vrot.slane %v3869_v60, 1 }
 0x10e   : > { %v1524_v19 = vadd.f32 %v1492_v3, %v1454_v34  ;;  %v3881_v42 = vmul.f32 %v3424_v17, %v3782_v30  ;;  %v895_v57 = vadd.f32 %v815_v4, %v649_v13  ;;  %v933_v40 = vmul.f32 %v3505_v9, %v3775_v58 }
 0x10f   : > { %v2211_v39 = vmul.f32 %v2179_v8, %v2083_v20  ;;  %v1572_v11 = vmul.f32 %v3434_v45, %v3864_v37  ;;  %v2084_v61 = vmul.f32 0.5, %v2052_v53  ;;  %v1373_v14 = vrot.slane %v1257_v41, 2  ;;  %v3911_v8 = vld [vmem:[#allocation2 + $0x130] sm:$0x3] }
 0x110   : > { %v1769_v15 = vadd.f32 %v1687_v63, %v1524_v19  ;;  %v1374_v24 = vrot.slane %v3881_v42, 2  ;;  %v965_v10 = vadd.f32 %v933_v40, %v895_v57  ;;  %v1130_v27 = vsel %vm516_vm2, %v1128_v52, %v1129_v28 }
 0x111   : > { %v2243_v18 = vadd.f32 %v2211_v39, %v4563_v32  ;;  %v1573_v20 = vmul.f32 %v3434_v45, %v3874_v44  ;;  %v1688_v3 = vrot.slane %v1572_v11, 1  ;;  %v1817_v48 = vmul.f32 %v3441_v50, %v3864_v37 }
 0x112   : > { %v2014_v6 = vadd.f32 %v1932_v1, %v1769_v15  ;;  %v1818_v35 = vmul.f32 %v3441_v50, %v3874_v44  ;;  %v1210_v12 = vadd.f32 %v1130_v27, %v965_v10  ;;  %v1375_v59 = vsel %vm762_vm3, %v1373_v14, %v1374_v24  ;;  %v4564_v15 = vld [vmem:[#allocation18_spill] sm:$0xff] }
 0x113   : > { %2275 = vst.msk [vmem:[%s3091_s17 + $0x88] sm:$0xff] %vm203_vm0, %v2243_v18  ;;  %v1689_v53 = vrot.slane %v1573_v20, 1  ;;  %v452_v22 = vmul.f32 %v3383_v51, %v3727_v46  ;;  %v1933_v43 = vrot.slane %v1817_v48, 2  ;;  %v698_v21 = vmul.f32 %v3390_v5, %v3727_v46 }
 0x114   : > { %v2053_v33 = vadd.f32 %v3617_v31, %v2014_v6  ;;  %v1934_v54 = vrot.slane %v1818_v35, 2  ;;  %v1455_v25 = vadd.f32 %v1375_v59, %v1210_v12  ;;  %v1493_v56 = vmul.f32 %v3449_v26, %v3864_v37 }
 0x115   : > { %v372_v23 = vmul.f32 %v3399_v49, %v3690_v38  ;;  %v570_v63 = vrot.slane %v452_v22, 1  ;;  %v1690_v36 = vsel %vm516_vm2, %v1688_v3, %v1689_v53  ;;  %v816_v0 = vrot.slane %v698_v21, 2 }
 0x116   : > { %v2420_v1 = vpop.eup %2419  ;;  %v2117_v62 = vmul.f32 0.70710677, %v2053_v33  ;;  %v934_v34 = vmul.f32 %v3505_v9, %v3782_v30  ;;  %v1525_v60 = vadd.f32 %v1493_v56, %v1455_v25  ;;  %v1014_v13 = vmul.f32 %v3411_v47, %v3817_v16 }
 0x117   : > { %v2180_v29 = vadd.f32 1.0, %v2420_v1  ;;  %v571_v46 = vsel %vm516_vm2, %v568_v2, %v570_v63  ;;  %v1935_v38 = vsel %vm762_vm3, %v1933_v43, %v1934_v54  ;;  %v1259_v52 = vmul.f32 %v3424_v17, %v3817_v16 }
 0x118   : > { %2421 = verf.f32 %v2117_v62  ;;  %v650_v4 = vadd.f32 %v571_v46, %v372_v23  ;;  %v1770_v41 = vadd.f32 %v1690_v36, %v1525_v60  ;;  %v817_v42 = vsel %vm762_vm3, %v814_v55, %v816_v0  ;;  %v3968_v62 = vld [vmem:[#allocation2 + $0x140] sm:$0xff] }
 0x119   : > { %v2212_v19 = vmul.f32 %v2180_v29, %v2084_v61  ;;  %v1131_v39 = vrot.slane %v1014_v13, 1  ;;  %v1376_v2 = vrot.slane %v1259_v52, 2  ;;  %v1574_v40 = vmul.f32 %v3434_v45, %v3911_v8 }
 0x11a   : > { %v896_v57 = vadd.f32 %v817_v42, %v650_v4  ;;  %v1819_v11 = vmul.f32 %v3441_v50, %v3911_v8  ;;  %v2085_v32 = vmul.f32 0.5, %v2053_v33  ;;  %v2015_v18 = vadd.f32 %v1935_v38, %v1770_v41 }
 0x11b   : > { %v2244_v14 = vadd.f32 %v2212_v19, %v4564_v15  ;;  %v1494_v61 = vmul.f32 %v3449_v26, %v3874_v44  ;;  %v1132_v7 = vsel %vm516_vm2, %v1129_v28, %v1131_v39  ;;  %v1691_v55 = vrot.slane %v1574_v40, 1 }
 0x11c   : > { %v966_v10 = vadd.f32 %v934_v34, %v896_v57  ;;  %v1936_v27 = vrot.slane %v1819_v11, 2  ;;  %v2054_v20 = vadd.f32 %v3617_v31, %v2015_v18  ;;  %v453_v6 = vmul.f32 %v3383_v51, %v3775_v58  ;;  %v4565_v57 = vld [vmem:[#allocation19_spill] sm:$0xff] }
 0x11d   : > { %2276 = vst.msk [vmem:[%s3091_s17 + $0x90] sm:$0xff] %vm203_vm0, %v2244_v14  ;;  %v3937_v3 = vmul.f32 %v3383_v51, %v3782_v30  ;;  %v699_v48 = vmul.f32 %v3390_v5, %v3775_v58  ;;  %v1377_v35 = vsel %vm762_vm3, %v1374_v24, %v1376_v2  ;;  %v373_v28 = vmul.f32 %v3399_v49, %v3775_v58 }
 0x11e   : > { %v1211_v26 = vadd.f32 %v1132_v7, %v966_v10  ;;  %v3946_v12 = vmul.f32 %v3390_v5, %v3782_v30  ;;  %v2118_v59 = vmul.f32 0.70710677, %v2054_v20  ;;  %v1692_v22 = vsel %vm516_vm2, %v1689_v53, %v1691_v55  ;;  %v3961_v53 = vld [vmem:[#allocation2 + $0x138] sm:$0xff]  ;;  %v4005_v7 = vld [vmem:[%s4469_s1 + $0x1] ss:$0 sm:$0xff] }
 0x11f   : > { %v572_v33 = vrot.slane %v453_v6, 1  ;;  %v573_v51 = vrot.slane %v3937_v3, 1  ;;  %v1937_v21 = vsel %vm762_vm3, %v1934_v54, %v1936_v27  ;;  %v818_v25 = vrot.slane %v699_v48, 2  ;;  %v4012_v55 = vld [vmem:[%s4469_s1 + $0x2] ss:$0 sm:$0xff] }
 0x120   : > { %v1456_v43 = vadd.f32 %v1377_v35, %v1211_v26  ;;  %v819_v56 = vrot.slane %v3946_v12, 2  ;;  %2423 = verf.f32 %v2118_v59  ;;  %v1015_v5 = vmul.f32 %v3411_v47, %v3864_v37  ;;  %v4019_v48 = vld [vmem:[%s4469_s1 + $0x8] ss:$0 sm:$0xff]  ;;  %v4026_v35 = vld [vmem:[%s4469_s1] ss:$0 sm:$0xff] }
 0x121   : > { %v574_v49 = vsel %vm516_vm2, %v572_v33, %v573_v51  ;;  %v3959_v58 = vmul.f32 %v3411_v47, %v3874_v44  ;;  %v1260_v1 = vmul.f32 %v3424_v17, %v3864_v37  ;;  %v3973_v47 = vmul.f32 %v3424_v17, %v3874_v44 }
 0x122   : > { %v2422_v24 = vpop.eup %2421  ;;  %v1526_v23 = vadd.f32 %v1494_v61, %v1456_v43  ;;  %v651_v54 = vadd.f32 %v574_v49, %v373_v28  ;;  %v820_v63 = vsel %vm762_vm3, %v818_v25, %v819_v56  ;;  %v1133_v0 = vrot.slane %v1015_v5, 1  ;;  %v4033_v49 = vld [vmem:[#allocation2 + $0x148] sm:$0x3]  ;;  %v4038_v5 = vld [vmem:[%s4469_s1 + $0x5] ss:$0 sm:$0xff] }
 0x123   : > { %v2181_v36 = vadd.f32 1.0, %v2422_v24  ;;  %v1134_v34 = vrot.slane %v3959_v58, 1  ;;  %v935_v46 = vmul.f32 %v3505_v9, %v3864_v37  ;;  %v1378_v13 = vrot.slane %v1260_v1, 2 }
 0x124   : > { %v1771_v29 = vadd.f32 %v1692_v22, %v1526_v23  ;;  %v897_v60 = vadd.f32 %v820_v63, %v651_v54  ;;  %v2086_v4 = vmul.f32 0.5, %v2054_v20  ;;  %v1379_v52 = vrot.slane %v3973_v47, 2  ;;  %v4051_v63 = vld [vmem:[%s4469_s1 + $0x6] ss:$0 sm:$0xff] }
 0x125   : > { %v2213_v38 = vmul.f32 %v2181_v36, %v2085_v32  ;;  %v1575_v19 = vmul.f32 %v3434_v45, %v3961_v53  ;;  %v3982_v17 = vmul.f32 %v3434_v45, %v3968_v62  ;;  %v1820_v39 = vmul.f32 %v3441_v50, %v3961_v53 }
 0x126   : > { %v2016_v41 = vadd.f32 %v1937_v21, %v1771_v29  ;;  %v967_v42 = vadd.f32 %v935_v46, %v897_v60  ;;  %v1135_v40 = vsel %vm516_vm2, %v1133_v0, %v1134_v34  ;;  %v3992_v15 = vmul.f32 %v3441_v50, %v3968_v62 }
 0x127   : > { %v2245_v2 = vadd.f32 %v2213_v38, %v4565_v57  ;;  %v1693_v11 = vrot.slane %v1575_v19, 1  ;;  %v1380_v45 = vsel %vm762_vm3, %v1378_v13, %v1379_v52  ;;  %v1694_v18 = vrot.slane %v3982_v17, 1  ;;  %v4068_v13 = vld [vmem:[%s4469_s1 + $0xa] ss:$0 sm:$0xff]  ;;  %v4566_v38 = vld [vmem:[#allocation20_spill] sm:$0xff] }
 0x128   : > { %v2055_v14 = vadd.f32 %v3617_v31, %v2016_v41  ;;  %v1212_v32 = vadd.f32 %v1135_v40, %v967_v42  ;;  %v1938_v61 = vrot.slane %v1820_v39, 2  ;;  %v1939_v10 = vrot.slane %v3992_v15, 2 }
 0x129   : > { %2277 = vst.msk [vmem:[%s3091_s17 + $0x98] sm:$0xff] %vm203_vm0, %v2245_v2  ;;  %v455_v50 = vmul.f32 %v4005_v7, %v3817_v16  ;;  %v701_v27 = vmul.f32 %v4012_v55, %v3817_v16  ;;  %v1495_v26 = vmul.f32 %v4019_v48, %v3961_v53  ;;  %v374_v28 = vmul.f32 %v4026_v35, %v3782_v30 }
 0x12a   : > { %v2119_v20 = vmul.f32 0.70710677, %v2055_v14  ;;  %v1457_v6 = vadd.f32 %v1380_v45, %v1212_v32  ;;  %v2424_v59 = vpop.eup %2423  ;;  %v4030_v16 = vmul.f32 0.5, %v2055_v14  ;;  %v1695_v22 = vsel %vm516_vm2, %v1693_v11, %v1694_v18 }
 0x12b   : > { %v575_v33 = vrot.slane %v455_v50, 1  ;;  %v821_v43 = vrot.slane %v701_v27, 2  ;;  %v2182_v21 = vadd.f32 1.0, %v2424_v59  ;;  %v1017_v30 = vmul.f32 %v4038_v5, %v3911_v8 }
 0x12c   : > { %2425 = verf.f32 %v2119_v20  ;;  %v1527_v25 = vadd.f32 %v1495_v26, %v1457_v6  ;;  %v1940_v24 = vsel %vm762_vm3, %v1938_v61, %v1939_v10  ;;  %v936_v54 = vmul.f32 %v3505_v9, %v3874_v44  ;;  %v4061_v9 = vld [vmem:[%s4469_s1 + $0x9] ss:$0 sm:$0xff]  ;;  %v4104_v26 = vld [vmem:[#allocation2 + $0x150] sm:$0xff] }
 0x12d   : > { %v576_v23 = vsel %vm516_vm2, %v573_v51, %v575_v33  ;;  %v1262_v1 = vmul.f32 %v4051_v63, %v3911_v8  ;;  %v2214_v36 = vmul.f32 %v2182_v21, %v2086_v4  ;;  %v822_v3 = vsel %vm762_vm3, %v819_v56, %v821_v43  ;;  %v4114_v21 = vld [vmem:[#allocation2 + $0x158] sm:$0xff] }
 0x12e   : > { %v1772_v0 = vadd.f32 %v1695_v22, %v1527_v25  ;;  %v652_v29 = vadd.f32 %v576_v23, %v374_v28  ;;  %v1136_v51 = vrot.slane %v1017_v30, 1  ;;  %v1577_v46 = vmul.f32 %v4061_v9, %v4033_v49 }
 0x12f   : > { %v1381_v60 = vrot.slane %v1262_v1, 2  ;;  %v1822_v12 = vmul.f32 %v4068_v13, %v4033_v49  ;;  %v2246_v56 = vadd.f32 %v2214_v36, %v4566_v38  ;;  %v1496_v41 = vmul.f32 %v4019_v48, %v3968_v62  ;;  %v4127_v36 = vld [vmem:[%s4469_s1 + $0x4] ss:$0 sm:$0xff] }
 0x130   : > { %v2017_v4 = vadd.f32 %v1940_v24, %v1772_v0  ;;  %v898_v19 = vadd.f32 %v822_v3, %v652_v29  ;;  %v1696_v42 = vrot.slane %v1577_v46, 1  ;;  %v375_v39 = vmul.f32 %v4026_v35, %v3864_v37 }
 0x131   : > { %v1941_v17 = vrot.slane %v1822_v12, 2  ;;  %v456_v57 = vmul.f32 %v4005_v7, %v3864_v37  ;;  %2278 = vst.msk [vmem:[%s3091_s17 + $0xa0] sm:$0xff] %vm203_vm0, %v2246_v56  ;;  %v4084_v11 = vmul.f32 %v4005_v7, %v3874_v44  ;;  %v702_v15 = vmul.f32 %v4012_v55, %v3864_v37  ;;  %v4567_v12 = vld [vmem:[#allocation21_spill] sm:$0xff] }
 0x132   : > { %v2056_v2 = vadd.f32 %v3617_v31, %v2017_v4  ;;  %v968_v40 = vadd.f32 %v936_v54, %v898_v19  ;;  %v1137_v14 = vsel %vm516_vm2, %v1134_v34, %v1136_v51  ;;  %v1382_v32 = vsel %vm762_vm3, %v1379_v52, %v1381_v60 }
 0x133   : > { %v577_v45 = vrot.slane %v456_v57, 1  ;;  %v4096_v61 = vmul.f32 %v4012_v55, %v3874_v44  ;;  %v1697_v20 = vsel %vm516_vm2, %v1694_v18, %v1696_v42  ;;  %v578_v6 = vrot.slane %v4084_v11, 1 }
 0x134   : > { %v2120_v50 = vmul.f32 0.70710677, %v2056_v2  ;;  %v1213_v27 = vadd.f32 %v1137_v14, %v968_v40  ;;  %v1942_v37 = vsel %vm762_vm3, %v1939_v10, %v1941_v17  ;;  %v823_v58 = vrot.slane %v702_v15, 2 }
 0x135   : > { %v824_v34 = vrot.slane %v4096_v61, 2  ;;  %v1018_v47 = vmul.f32 %v4038_v5, %v3961_v53  ;;  %v579_v59 = vsel %vm516_vm2, %v577_v45, %v578_v6  ;;  %v4109_v18 = vmul.f32 %v4038_v5, %v3968_v62 }
 0x136   : > { %v2426_v52 = vpop.eup %2425  ;;  %2427 = verf.f32 %v2120_v50  ;;  %v1458_v28 = vadd.f32 %v1382_v32, %v1213_v27  ;;  %v653_v33 = vadd.f32 %v579_v59, %v375_v39  ;;  %v1263_v24 = vmul.f32 %v4051_v63, %v3961_v53 }
 0x137   : > { %v2183_v22 = vadd.f32 1.0, %v2426_v52  ;;  %v825_v10 = vsel %vm762_vm3, %v823_v58, %v824_v34  ;;  %v1138_v43 = vrot.slane %v1018_v47, 1  ;;  %v1139_v30 = vrot.slane %v4109_v18, 1 }
 0x138   : > { %v1528_v25 = vadd.f32 %v1496_v41, %v1458_v28  ;;  %v4121_v23 = vmul.f32 %v4051_v63, %v3968_v62  ;;  %v899_v1 = vadd.f32 %v825_v10, %v653_v33  ;;  %v937_v0 = vmul.f32 %v4127_v36, %v3961_v53 }
 0x139   : > { %v2215_v54 = vmul.f32 %v2183_v22, %v4030_v16  ;;  %v1578_v29 = vmul.f32 %v4061_v9, %v4104_v26  ;;  %v2088_v3 = vmul.f32 0.5, %v2056_v2  ;;  %v1383_v60 = vrot.slane %v1263_v24, 2  ;;  %v4157_v22 = vld [vmem:[#allocation2 + $0x160] sm:$0x3] }
 0x13a   : > { %v1773_v51 = vadd.f32 %v1697_v20, %v1528_v25  ;;  %v1384_v46 = vrot.slane %v4121_v23, 2  ;;  %v969_v38 = vadd.f32 %v937_v0, %v899_v1  ;;  %v1140_v56 = vsel %vm516_vm2, %v1138_v43, %v1139_v30 }
 0x13b   : > { %v2247_v16 = vadd.f32 %v2215_v54, %v4567_v12  ;;  %v1579_v4 = vmul.f32 %v4061_v9, %v4114_v21  ;;  %v1698_v41 = vrot.slane %v1578_v29, 1  ;;  %v1823_v42 = vmul.f32 %v4068_v13, %v4104_v26 }
 0x13c   : > { %v2018_v19 = vadd.f32 %v1942_v37, %v1773_v51  ;;  %v1824_v17 = vmul.f32 %v4068_v13, %v4114_v21  ;;  %v1214_v39 = vadd.f32 %v1140_v56, %v969_v38  ;;  %v1385_v57 = vsel %vm762_vm3, %v1383_v60, %v1384_v46  ;;  %v4568_v51 = vld [vmem:[#allocation22_spill] sm:$0xff] }
 0x13d   : > { %2279 = vst.msk [vmem:[%s3091_s17 + $0xa8] sm:$0xff] %vm203_vm0, %v2247_v16  ;;  %v1699_v2 = vrot.slane %v1579_v4, 1  ;;  %v458_v40 = vmul.f32 %v4005_v7, %v3911_v8  ;;  %v1943_v15 = vrot.slane %v1823_v42, 2  ;;  %v704_v32 = vmul.f32 %v4012_v55, %v3911_v8 }
 0x13e   : > { %v2057_v11 = vadd.f32 %v3617_v31, %v2018_v19  ;;  %v1944_v14 = vrot.slane %v1824_v17, 2  ;;  %v1459_v45 = vadd.f32 %v1385_v57, %v1214_v39  ;;  %v1497_v50 = vmul.f32 %v4019_v48, %v4104_v26 }
 0x13f   : > { %v376_v27 = vmul.f32 %v4026_v35, %v3874_v44  ;;  %v580_v20 = vrot.slane %v458_v40, 1  ;;  %v1700_v47 = vsel %vm516_vm2, %v1698_v41, %v1699_v2  ;;  %v826_v52 = vrot.slane %v704_v32, 2 }
 0x140   : > { %v2428_v37 = vpop.eup %2427  ;;  %v2121_v58 = vmul.f32 0.70710677, %v2057_v11  ;;  %v938_v28 = vmul.f32 %v4127_v36, %v3968_v62  ;;  %v1529_v18 = vadd.f32 %v1497_v50, %v1459_v45  ;;  %v1020_v33 = vmul.f32 %v4038_v5, %v4033_v49 }
 0x141   : > { %v2184_v59 = vadd.f32 1.0, %v2428_v37  ;;  %v581_v8 = vsel %vm516_vm2, %v578_v6, %v580_v20  ;;  %v1945_v44 = vsel %vm762_vm3, %v1943_v15, %v1944_v14  ;;  %v1265_v43 = vmul.f32 %v4051_v63, %v4033_v49  ;;  %v4205_v37 = vld [vmem:[#allocation2 + $0x168] sm:$0xff] }
 0x142   : > { %2429 = verf.f32 %v2121_v58  ;;  %v654_v10 = vadd.f32 %v581_v8, %v376_v27  ;;  %v1774_v24 = vadd.f32 %v1700_v47, %v1529_v18  ;;  %v827_v23 = vsel %vm762_vm3, %v824_v34, %v826_v52 }
 0x143   : > { %v2216_v25 = vmul.f32 %v2184_v59, %v2088_v3  ;;  %v1141_v54 = vrot.slane %v1020_v33, 1  ;;  %v1386_v6 = vrot.slane %v1265_v43, 2  ;;  %v1580_v0 = vmul.f32 %v4061_v9, %v4157_v22 }
 0x144   : > { %v900_v1 = vadd.f32 %v827_v23, %v654_v10  ;;  %v1825_v29 = vmul.f32 %v4068_v13, %v4157_v22  ;;  %v2089_v12 = vmul.f32 0.5, %v2057_v11  ;;  %v2019_v16 = vadd.f32 %v1945_v44, %v1774_v24 }
 0x145   : > { %v2248_v60 = vadd.f32 %v2216_v25, %v4568_v51  ;;  %v1498_v3 = vmul.f32 %v4019_v48, %v4114_v21  ;;  %v1142_v61 = vsel %vm516_vm2, %v1139_v30, %v1141_v54  ;;  %v1701_v34 = vrot.slane %v1580_v0, 1 }
 0x146   : > { %v970_v38 = vadd.f32 %v938_v28, %v900_v1  ;;  %v1946_v56 = vrot.slane %v1825_v29, 2  ;;  %v2058_v4 = vadd.f32 %v3617_v31, %v2019_v16  ;;  %v459_v19 = vmul.f32 %v4005_v7, %v3961_v53  ;;  %v4212_v28 = vld [vmem:[#allocation2 + $0x170] sm:$0xff] }
 0x147   : > { %2280 = vst.msk [vmem:[%s3091_s17 + $0xb0] sm:$0xff] %vm203_vm0, %v2248_v60  ;;  %v4183_v41 = vmul.f32 %v4005_v7, %v3968_v62  ;;  %v705_v42 = vmul.f32 %v4012_v55, %v3961_v53  ;;  %v1387_v39 = vsel %vm762_vm3, %v1384_v46, %v1386_v6  ;;  %v377_v30 = vmul.f32 %v4026_v35, %v3961_v53  ;;  %v4569_v60 = vld [vmem:[#allocation23_spill] sm:$0xff] }
 0x148   : > { %v1215_v17 = vadd.f32 %v1142_v61, %v970_v38  ;;  %v4192_v57 = vmul.f32 %v4012_v55, %v3968_v62  ;;  %v2122_v31 = vmul.f32 0.70710677, %v2058_v4  ;;  %v1702_v40 = vsel %vm516_vm2, %v1699_v2, %v1701_v34  ;;  %v4239_v61 = vld [vmem:[%s4470_s2] ss:$0 sm:$0xff] }
 0x149   : > { %v582_v11 = vrot.slane %v459_v19, 1  ;;  %v583_v15 = vrot.slane %v4183_v41, 1  ;;  %v1947_v45 = vsel %vm762_vm3, %v1944_v14, %v1946_v56  ;;  %v828_v50 = vrot.slane %v705_v42, 2 }
 0x14a   : > { %v1460_v32 = vadd.f32 %v1387_v39, %v1215_v17  ;;  %v829_v27 = vrot.slane %v4192_v57, 2  ;;  %2431 = verf.f32 %v2122_v31  ;;  %v1021_v53 = vmul.f32 %v4038_v5, %v4104_v26 }
 0x14b   : > { %v584_v46 = vsel %vm516_vm2, %v582_v11, %v583_v15  ;;  %v4203_v20 = vmul.f32 %v4038_v5, %v4114_v21  ;;  %v1266_v52 = vmul.f32 %v4051_v63, %v4104_v26  ;;  %v4217_v33 = vmul.f32 %v4051_v63, %v4114_v21 }
 0x14c   : > { %v2430_v2 = vpop.eup %2429  ;;  %v1530_v58 = vadd.f32 %v1498_v3, %v1460_v32  ;;  %v655_v47 = vadd.f32 %v584_v46, %v377_v30  ;;  %v830_v14 = vsel %vm762_vm3, %v828_v50, %v829_v27  ;;  %v1143_v18 = vrot.slane %v1021_v53, 1 }
 0x14d   : > { %v2185_v59 = vadd.f32 1.0, %v2430_v2  ;;  %v1144_v8 = vrot.slane %v4203_v20, 1  ;;  %v939_v43 = vmul.f32 %v4127_v36, %v4104_v26  ;;  %v1388_v25 = vrot.slane %v1266_v52, 2 }
 0x14e   : > { %v1775_v44 = vadd.f32 %v1702_v40, %v1530_v58  ;;  %v901_v10 = vadd.f32 %v830_v14, %v655_v47  ;;  %v2090_v23 = vmul.f32 0.5, %v2058_v4  ;;  %v1389_v54 = vrot.slane %v4217_v33, 2  ;;  %v4255_v47 = vld [vmem:[#allocation2 + $0x178] sm:$0x3] }
 0x14f   : > { %v2217_v24 = vmul.f32 %v2185_v59, %v2089_v12  ;;  %v1581_v1 = vmul.f32 %v4061_v9, %v4205_v37  ;;  %v4226_v29 = vmul.f32 %v4061_v9, %v4212_v28  ;;  %v1826_v51 = vmul.f32 %v4068_v13, %v4205_v37 }
 0x150   : > { %v2020_v6 = vadd.f32 %v1947_v45, %v1775_v44  ;;  %v971_v0 = vadd.f32 %v939_v43, %v901_v10  ;;  %v1145_v12 = vsel %vm516_vm2, %v1143_v18, %v1144_v8  ;;  %v1827_v38 = vmul.f32 %v4068_v13, %v4212_v28 }
 0x151   : > { %v2249_v16 = vadd.f32 %v2217_v24, %v4569_v60  ;;  %v1703_v3 = vrot.slane %v1581_v1, 1  ;;  %v1390_v4 = vsel %vm762_vm3, %v1388_v25, %v1389_v54  ;;  %v1704_v19 = vrot.slane %v4226_v29, 1  ;;  %v4570_v1 = vld [vmem:[#allocation24_spill] sm:$0xff] }
 0x152   : > { %v2059_v34 = vadd.f32 %v4239_v61, %v2020_v6  ;;  %v1216_v56 = vadd.f32 %v1145_v12, %v971_v0  ;;  %v1948_v41 = vrot.slane %v1826_v51, 2  ;;  %v1949_v42 = vrot.slane %v1827_v38, 2 }
 0x153   : > { %2281 = vst.msk [vmem:[%s3091_s17 + $0xb8] sm:$0xff] %vm203_vm0, %v2249_v16  ;;  %v461_v17 = vmul.f32 %v4005_v7, %v4033_v49  ;;  %v707_v39 = vmul.f32 %v4012_v55, %v4033_v49  ;;  %v1499_v40 = vmul.f32 %v4019_v48, %v4205_v37  ;;  %v378_v11 = vmul.f32 %v4026_v35, %v3968_v62 }
 0x154   : > { %v2123_v30 = vmul.f32 0.70710677, %v2059_v34  ;;  %v1461_v31 = vadd.f32 %v1390_v4, %v1216_v56  ;;  %v2432_v32 = vpop.eup %2431  ;;  %v2091_v45 = vmul.f32 0.5, %v2059_v34  ;;  %v1705_v50 = vsel %vm516_vm2, %v1703_v3, %v1704_v19 }
 0x155   : > { %v585_v46 = vrot.slane %v461_v17, 1  ;;  %v831_v53 = vrot.slane %v707_v39, 2  ;;  %v2186_v2 = vadd.f32 1.0, %v2432_v32  ;;  %v1023_v49 = vmul.f32 %v4038_v5, %v4157_v22  ;;  %v4302_v32 = vld [vmem:[#allocation2 + $0x180] sm:$0xff] }
 0x156   : > { %2433 = verf.f32 %v2123_v30  ;;  %v1531_v58 = vadd.f32 %v1499_v40, %v1461_v31  ;;  %v1950_v14 = vsel %vm762_vm3, %v1948_v41, %v1949_v42  ;;  %v940_v62 = vmul.f32 %v4127_v36, %v4114_v21 }
 0x157   : > { %v586_v52 = vsel %vm516_vm2, %v583_v15, %v585_v46  ;;  %v1268_v59 = vmul.f32 %v4051_v63, %v4157_v22  ;;  %v2218_v18 = vmul.f32 %v2186_v2, %v2090_v23  ;;  %v832_v10 = vsel %vm762_vm3, %v829_v27, %v831_v53 }
 0x158   : > { %v1776_v33 = vadd.f32 %v1705_v50, %v1531_v58  ;;  %v656_v44 = vadd.f32 %v586_v52, %v378_v11  ;;  %v1146_v43 = vrot.slane %v1023_v49, 1  ;;  %v1583_v24 = vmul.f32 %v4061_v9, %v4255_v47  ;;  %v4312_v49 = vld [vmem:[#allocation2 + $0x188] sm:$0xff] }
 0x159   : > { %v1391_v25 = vrot.slane %v1268_v59, 2  ;;  %v1828_v15 = vmul.f32 %v4068_v13, %v4255_v47  ;;  %v2250_v6 = vadd.f32 %v2218_v18, %v4570_v1  ;;  %v1500_v23 = vmul.f32 %v4019_v48, %v4212_v28 }
 0x15a   : > { %v2021_v0 = vadd.f32 %v1950_v14, %v1776_v33  ;;  %v902_v29 = vadd.f32 %v832_v10, %v656_v44  ;;  %v1706_v51 = vrot.slane %v1583_v24, 1  ;;  %v379_v57 = vmul.f32 %v4026_v35, %v4104_v26 }
 0x15b   : > { %v1951_v60 = vrot.slane %v1828_v15, 2  ;;  %v462_v27 = vmul.f32 %v4005_v7, %v4104_v26  ;;  %2282 = vst.msk [vmem:[%s3091_s17 + $0xc0] sm:$0xff] %vm203_vm0, %v2250_v6  ;;  %v4284_v3 = vmul.f32 %v4005_v7, %v4114_v21  ;;  %v708_v38 = vmul.f32 %v4012_v55, %v4104_v26  ;;  %v4571_v15 = vld [vmem:[#allocation25_spill] sm:$0xff] }
 0x15c   : > { %v2060_v16 = vadd.f32 %v4239_v61, %v2021_v0  ;;  %v972_v12 = vadd.f32 %v940_v62, %v902_v29  ;;  %v1147_v34 = vsel %vm516_vm2, %v1144_v8, %v1146_v43  ;;  %v1392_v56 = vsel %vm762_vm3, %v1389_v54, %v1391_v25 }
 0x15d   : > { %v587_v4 = vrot.slane %v462_v27, 1  ;;  %v4294_v41 = vmul.f32 %v4012_v55, %v4114_v21  ;;  %v1707_v30 = vsel %vm516_vm2, %v1704_v19, %v1706_v51  ;;  %v588_v31 = vrot.slane %v4284_v3, 1 }
 0x15e   : > { %v2124_v17 = vmul.f32 0.70710677, %v2060_v16  ;;  %v1217_v39 = vadd.f32 %v1147_v34, %v972_v12  ;;  %v1952_v40 = vsel %vm762_vm3, %v1949_v42, %v1951_v60  ;;  %v833_v26 = vrot.slane %v708_v38, 2 }
 0x15f   : > { %v834_v20 = vrot.slane %v4294_v41, 2  ;;  %v1024_v8 = vmul.f32 %v4038_v5, %v4205_v37  ;;  %v589_v50 = vsel %vm516_vm2, %v587_v4, %v588_v31  ;;  %v4307_v19 = vmul.f32 %v4038_v5, %v4212_v28 }
 0x160   : > { %v2434_v54 = vpop.eup %2433  ;;  %2435 = verf.f32 %v2124_v17  ;;  %v1462_v11 = vadd.f32 %v1392_v56, %v1217_v39  ;;  %v657_v53 = vadd.f32 %v589_v50, %v379_v57  ;;  %v1269_v52 = vmul.f32 %v4051_v63, %v4205_v37 }
 0x161   : > { %v2187_v46 = vadd.f32 1.0, %v2434_v54  ;;  %v835_v42 = vsel %vm762_vm3, %v833_v26, %v834_v20  ;;  %v1148_v2 = vrot.slane %v1024_v8, 1  ;;  %v1149_v14 = vrot.slane %v4307_v19, 1 }
 0x162   : > { %v1532_v58 = vadd.f32 %v1500_v23, %v1462_v11  ;;  %v4319_v62 = vmul.f32 %v4051_v63, %v4212_v28  ;;  %v903_v18 = vadd.f32 %v835_v42, %v657_v53  ;;  %v941_v33 = vmul.f32 %v4127_v36, %v4205_v37 }
 0x163   : > { %v2219_v59 = vmul.f32 %v2187_v46, %v2091_v45  ;;  %v1584_v44 = vmul.f32 %v4061_v9, %v4302_v32  ;;  %v2092_v10 = vmul.f32 0.5, %v2060_v16  ;;  %v1393_v25 = vrot.slane %v1269_v52, 2  ;;  %v4349_v46 = vld [vmem:[#allocation2 + $0x190] sm:$0x3] }
 0x164   : > { %v1777_v43 = vadd.f32 %v1707_v30, %v1532_v58  ;;  %v1394_v24 = vrot.slane %v4319_v62, 2  ;;  %v973_v6 = vadd.f32 %v941_v33, %v903_v18  ;;  %v1150_v0 = vsel %vm516_vm2, %v1148_v2, %v1149_v14 }
 0x165   : > { %v2251_v1 = vadd.f32 %v2219_v59, %v4571_v15  ;;  %v1585_v45 = vmul.f32 %v4061_v9, %v4312_v49  ;;  %v1708_v23 = vrot.slane %v1584_v44, 1  ;;  %v1829_v51 = vmul.f32 %v4068_v13, %v4302_v32 }
 0x166   : > { %v2022_v29 = vadd.f32 %v1952_v40, %v1777_v43  ;;  %v1830_v60 = vmul.f32 %v4068_v13, %v4312_v49  ;;  %v1218_v57 = vadd.f32 %v1150_v0, %v973_v6  ;;  %v1395_v27 = vsel %vm762_vm3, %v1393_v25, %v1394_v24  ;;  %v4572_v43 = vld [vmem:[#allocation26_spill] sm:$0xff] }
 0x167   : > { %2283 = vst.msk [vmem:[%s3091_s17 + $0xc8] sm:$0xff] %vm203_vm0, %v2251_v1  ;;  %v1709_v16 = vrot.slane %v1585_v45, 1  ;;  %v464_v12 = vmul.f32 %v4005_v7, %v4157_v22  ;;  %v1953_v38 = vrot.slane %v1829_v51, 2  ;;  %v710_v56 = vmul.f32 %v4012_v55, %v4157_v22 }
 0x168   : > { %v2061_v3 = vadd.f32 %v4239_v61, %v2022_v29  ;;  %v1954_v34 = vrot.slane %v1830_v60, 2  ;;  %v1463_v4 = vadd.f32 %v1395_v27, %v1218_v57  ;;  %v1501_v17 = vmul.f32 %v4019_v48, %v4302_v32 }
 0x169   : > { %v380_v39 = vmul.f32 %v4026_v35, %v4114_v21  ;;  %v590_v30 = vrot.slane %v464_v12, 1  ;;  %v1710_v8 = vsel %vm516_vm2, %v1708_v23, %v1709_v16  ;;  %v836_v54 = vrot.slane %v710_v56, 2 }
 0x16a   : > { %v2436_v40 = vpop.eup %2435  ;;  %v2125_v26 = vmul.f32 0.70710677, %v2061_v3  ;;  %v942_v11 = vmul.f32 %v4127_v36, %v4212_v28  ;;  %v1533_v19 = vadd.f32 %v1501_v17, %v1463_v4  ;;  %v1026_v53 = vmul.f32 %v4038_v5, %v4255_v47 }
 0x16b   : > { %v2188_v50 = vadd.f32 1.0, %v2436_v40  ;;  %v591_v22 = vsel %vm516_vm2, %v588_v31, %v590_v30  ;;  %v1955_v21 = vsel %vm762_vm3, %v1953_v38, %v1954_v34  ;;  %v1271_v2 = vmul.f32 %v4051_v63, %v4255_v47 }
 0x16c   : > { %2437 = verf.f32 %v2125_v26  ;;  %v658_v42 = vadd.f32 %v591_v22, %v380_v39  ;;  %v1778_v52 = vadd.f32 %v1710_v8, %v1533_v19  ;;  %v837_v62 = vsel %vm762_vm3, %v834_v20, %v836_v54  ;;  %v343_v8 = vld [vmem:[#allocation2 + $0x198] sm:$0xff]  ;;  %v4402_v19 = vld [vmem:[#allocation2 + $0x1a0] sm:$0xff] }
 0x16d   : > { %v2220_v58 = vmul.f32 %v2188_v50, %v2092_v10  ;;  %v1151_v59 = vrot.slane %v1026_v53, 1  ;;  %v1396_v31 = vrot.slane %v1271_v2, 2  ;;  %v1586_v33 = vmul.f32 %v4061_v9, %v4349_v46 }
 0x16e   : > { %v904_v18 = vadd.f32 %v837_v62, %v658_v42  ;;  %v1831_v44 = vmul.f32 %v4068_v13, %v4349_v46  ;;  %v2093_v15 = vmul.f32 0.5, %v2061_v3  ;;  %v2023_v1 = vadd.f32 %v1955_v21, %v1778_v52 }
 0x16f   : > { %v2252_v25 = vadd.f32 %v2220_v58, %v4572_v43  ;;  %v1502_v10 = vmul.f32 %v4019_v48, %v4312_v49  ;;  %v1152_v41 = vsel %vm516_vm2, %v1149_v14, %v1151_v59  ;;  %v1711_v20 = vrot.slane %v1586_v33, 1 }
 0x170   : > { %v974_v6 = vadd.f32 %v942_v11, %v904_v18  ;;  %v1956_v0 = vrot.slane %v1831_v44, 2  ;;  %v2062_v45 = vadd.f32 %v4239_v61, %v2023_v1  ;;  %v465_v29 = vmul.f32 %v4005_v7, %v4205_v37  ;;  %v4573_v1 = vld [vmem:[#allocation27_spill] sm:$0xff] }
 0x171   : > { %2284 = vst.msk [vmem:[%s3091_s17 + $0xd0] sm:$0xff] %vm203_vm0, %v2252_v25  ;;  %v4375_v23 = vmul.f32 %v4005_v7, %v4212_v28  ;;  %v711_v51 = vmul.f32 %v4012_v55, %v4205_v37  ;;  %v1397_v57 = vsel %vm762_vm3, %v1394_v24, %v1396_v31  ;;  %v381_v14 = vmul.f32 %v4026_v35, %v4205_v37 }
 0x172   : > { %v1219_v60 = vadd.f32 %v1152_v41, %v974_v6  ;;  %v4384_v27 = vmul.f32 %v4012_v55, %v4212_v28  ;;  %v2126_v12 = vmul.f32 0.70710677, %v2062_v45  ;;  %v1712_v3 = vsel %vm516_vm2, %v1709_v16, %v1711_v20 }
 0x173   : > { %v592_v38 = vrot.slane %v465_v29, 1  ;;  %v593_v56 = vrot.slane %v4375_v23, 1  ;;  %v1957_v17 = vsel %vm762_vm3, %v1954_v34, %v1956_v0  ;;  %v838_v39 = vrot.slane %v711_v51, 2 }
 0x174   : > { %v1464_v4 = vadd.f32 %v1397_v57, %v1219_v60  ;;  %v839_v30 = vrot.slane %v4384_v27, 2  ;;  %2439 = verf.f32 %v2126_v12  ;;  %v1027_v37 = vmul.f32 %v4038_v5, %v4302_v32 }
 0x175   : > { %v594_v24 = vsel %vm516_vm2, %v592_v38, %v593_v56  ;;  %v4395_v40 = vmul.f32 %v4038_v5, %v4312_v49  ;;  %v1272_v11 = vmul.f32 %v4051_v63, %v4302_v32  ;;  %v4407_v21 = vmul.f32 %v4051_v63, %v4312_v49 }
 0x176   : > { %v2438_v16 = vpop.eup %2437  ;;  %v1534_v26 = vadd.f32 %v1502_v10, %v1464_v4  ;;  %v659_v54 = vadd.f32 %v594_v24, %v381_v14  ;;  %v840_v34 = vsel %vm762_vm3, %v838_v39, %v839_v30  ;;  %v1153_v22 = vrot.slane %v1027_v37, 1 }
 0x177   : > { %v2189_v50 = vadd.f32 1.0, %v2438_v16  ;;  %v1154_v53 = vrot.slane %v4395_v40, 1  ;;  %v943_v58 = vmul.f32 %v4127_v36, %v4302_v32  ;;  %v1398_v52 = vrot.slane %v1272_v11, 2  ;;  %v345_v40 = vld [vmem:[#allocation2 + $0x1a8] sm:$0x3]  ;;  %v4574_v11 = vld [vmem:[#allocation28_spill] sm:$0xff] }
 0x178   : > { %v1779_v42 = vadd.f32 %v1712_v3, %v1534_v26  ;;  %v905_v2 = vadd.f32 %v840_v34, %v659_v54  ;;  %v1399_v18 = vrot.slane %v4407_v21, 2  ;;  %v1587_v31 = vmul.f32 %v4061_v9, %v343_v8 }
 0x179   : > { %v2221_v62 = vmul.f32 %v2189_v50, %v2093_v15  ;;  %v1155_v59 = vsel %vm516_vm2, %v1153_v22, %v1154_v53  ;;  %v1588_v43 = vmul.f32 %v4061_v9, %v4402_v19  ;;  %v1832_v25 = vmul.f32 %v4068_v13, %v343_v8 }
 0x17a   : > { %v2024_v33 = vadd.f32 %v1957_v17, %v1779_v42  ;;  %v975_v44 = vadd.f32 %v943_v58, %v905_v2  ;;  %v1713_v6 = vrot.slane %v1587_v31, 1  ;;  %v1833_v32 = vmul.f32 %v4068_v13, %v4402_v19 }
 0x17b   : > { %v2253_v10 = vadd.f32 %v2221_v62, %v4573_v1  ;;  %v1503_v20 = vmul.f32 %v4019_v48, %v343_v8  ;;  %v1714_v0 = vrot.slane %v1588_v43, 1  ;;  %v2094_v29 = vmul.f32 0.5, %v2062_v45  ;;  %v4575_v43 = vld [vmem:[#allocation29_spill] sm:$0xff] }
 0x17c   : > { %v2063_v15 = vadd.f32 %v4239_v61, %v2024_v33  ;;  %v1220_v41 = vadd.f32 %v1155_v59, %v975_v44  ;;  %v1400_v23 = vsel %vm762_vm3, %v1398_v52, %v1399_v18  ;;  %v467_v51 = vmul.f32 %v4005_v7, %v4255_v47 }
 0x17d   : > { %2285 = vst.msk [vmem:[%s3091_s17 + $0xd8] sm:$0xff] %vm203_vm0, %v2253_v10  ;;  %v713_v60 = vmul.f32 %v4012_v55, %v4255_v47  ;;  %v1958_v12 = vrot.slane %v1832_v25, 2  ;;  %v1959_v3 = vrot.slane %v1833_v32, 2  ;;  %v1715_v4 = vsel %vm516_vm2, %v1713_v6, %v1714_v0 }
 0x17e   : > { %v2127_v57 = vmul.f32 0.70710677, %v2063_v15  ;;  %v1465_v14 = vadd.f32 %v1400_v23, %v1220_v41  ;;  %v2440_v38 = vpop.eup %2439  ;;  %v382_v17 = vmul.f32 %v4026_v35, %v4212_v28  ;;  %v595_v39 = vrot.slane %v467_v51, 1  ;;  %v4576_v41 = vld [vmem:[#allocation30_spill] sm:$0xff] }
 0x17f   : > { %v841_v45 = vrot.slane %v713_v60, 2  ;;  %v2190_v24 = vadd.f32 1.0, %v2440_v38  ;;  %v1029_v7 = vmul.f32 %v4038_v5, %v4349_v46  ;;  %v944_v47 = vmul.f32 %v4127_v36, %v4312_v49  ;;  %v4577_v60 = vld [vmem:[#allocation31_spill] sm:$0xff] }
 0x180   : > { %2441 = verf.f32 %v2127_v57  ;;  %v1535_v37 = vadd.f32 %v1503_v20, %v1465_v14  ;;  %v596_v55 = vsel %vm516_vm2, %v593_v56, %v595_v39  ;;  %v1274_v16 = vmul.f32 %v4051_v63, %v4349_v46 }
 0x181   : > { %v2222_v26 = vmul.f32 %v2190_v24, %v2094_v29  ;;  %v660_v28 = vadd.f32 %v596_v55, %v382_v17  ;;  %v1156_v8 = vrot.slane %v1029_v7, 1  ;;  %v1960_v54 = vsel %vm762_vm3, %v1958_v12, %v1959_v3 }
 0x182   : > { %v1780_v35 = vadd.f32 %v1715_v4, %v1535_v37  ;;  %v842_v34 = vsel %vm762_vm3, %v839_v30, %v841_v45  ;;  %v1589_v5 = vmul.f32 %v4061_v9, %v345_v40  ;;  %v1401_v49 = vrot.slane %v1274_v16, 2 }
 0x183   : > { %v2254_v56 = vadd.f32 %v2222_v26, %v4574_v11  ;;  %v906_v22 = vadd.f32 %v842_v34, %v660_v28  ;;  %v1157_v36 = vsel %vm516_vm2, %v1154_v53, %v1156_v8  ;;  %v1834_v42 = vmul.f32 %v4068_v13, %v345_v40 }
 0x184   : > { %v2025_v50 = vadd.f32 %v1960_v54, %v1780_v35  ;;  %v1716_v21 = vrot.slane %v1589_v5, 1  ;;  %v1504_v9 = vmul.f32 %v4019_v48, %v4402_v19  ;;  %v1402_v30 = vsel %vm762_vm3, %v1399_v18, %v1401_v49 }
 0x185   : > { %2286 = vst.msk [vmem:[%s3091_s17 + $0xe0] sm:$0xff] %vm203_vm0, %v2254_v56  ;;  %v976_v46 = vadd.f32 %v944_v47, %v906_v22  ;;  %v2095_v52 = vmul.f32 0.5, %v2063_v15  ;;  %v1961_v31 = vrot.slane %v1834_v42, 2 }
 0x186   : > { %v2064_v63 = vadd.f32 %v4239_v61, %v2025_v50  ;;  %v1717_v59 = vsel %vm516_vm2, %v1714_v0, %v1716_v21 }
 0x187   : > { %v1221_v2 = vadd.f32 %v1157_v36, %v976_v46  ;;  %v1962_v1 = vsel %vm762_vm3, %v1959_v3, %v1961_v31 }
 0x188   : > { %v2128_v27 = vmul.f32 0.70710677, %v2064_v63  ;;  %v2096_v6 = vmul.f32 0.5, %v2064_v63 }
 0x189   : > { %v1466_v53 = vadd.f32 %v1402_v30, %v1221_v2 }
 0x18a   : > { %v2442_v58 = vpop.eup %2441  ;;  %2443 = verf.f32 %v2128_v27 }
 0x18b   : > { %v2191_v62 = vadd.f32 1.0, %v2442_v58  ;;  %v1536_v33 = vadd.f32 %v1504_v9, %v1466_v53 }
 0x18d   : > { %v2223_v44 = vmul.f32 %v2191_v62, %v2095_v52  ;;  %v1781_v13 = vadd.f32 %v1717_v59, %v1536_v33 }
 0x18f   : > { %v2255_v25 = vadd.f32 %v2223_v44, %v4575_v43  ;;  %v2026_v10 = vadd.f32 %v1962_v1, %v1781_v13 }
 0x191   : > { %2287 = vst.msk [vmem:[%s3091_s17 + $0xe8] sm:$0xff] %vm203_vm0, %v2255_v25  ;;  %v2065_v48 = vadd.f32 %v4239_v61, %v2026_v10 }
 0x193   : > { %v2129_v18 = vmul.f32 0.70710677, %v2065_v48  ;;  %v2097_v29 = vmul.f32 0.5, %v2065_v48 }
 0x194   : > { %v2444_v19 = vpop.eup %2443 }
 0x195   : > { %v2192_v32 = vadd.f32 1.0, %v2444_v19  ;;  %2445 = verf.f32 %v2129_v18 }
 0x197   : > { %v2224_v15 = vmul.f32 %v2192_v32, %v2096_v6 }
 0x199   : > { %v2256_v20 = vadd.f32 %v2224_v15, %v4576_v41 }
 0x19b   : > { %2288 = vst.msk [vmem:[%s3091_s17 + $0xf0] sm:$0xff] %vm203_vm0, %v2256_v20 }
 0x19f   : > { %v2446_v0 = vpop.eup %2445 }
 0x1a0   : > { %v2193_v23 = vadd.f32 1.0, %v2446_v0 }
 0x1a2   : > { %v2225_v51 = vmul.f32 %v2193_v23, %v2097_v29 }
 0x1a4   : > { %v2257_v57 = vadd.f32 %v2225_v51, %v4577_v60 }
 0x1a6   : > { %2289 = vst.msk [vmem:[%s3091_s17 + $0xf8] sm:$0xff] %vm203_vm0, %v2257_v57 }
 0x1a7 PF: > { %s13_s12 = sadd.s32 1, %s2473_s12  }
 0x1a8   : > { %p10_p4 = scmp.ge.s32.totalorder %s13_s12, 4  }
 0x1aa   :  { %12 = sbr.rel (!%p10_p4) target bundleno = 1 (0x1), region = 65 }

</bundles_post_ra>
